<compile_context>
chip_gen: v7x
topology: tpu7x:2x2x1
jax: 0.10.0
libtpu: 0.0.40
codegen_flags: <defaults>
</compile_context>

<pallas_src>
import numpy as np
import jax
import jax.numpy as jnp
from jax import lax
from jax.experimental import pallas as pl
from jax.experimental.pallas import tpu as pltpu

# ---------------- configuration (mirrors TSception_small.__init__) ----------------
SAMPLING_RATE = 1000          # padding (250,125) is hard-coded in the module, so
                              # sampling_rate must be 1000 for the two Tception
                              # branch widths to match (win/2 == padding).
CHN = 4                       # chnNum
NUM_T = 4                     # num_T temporal filters
PLAN = 2 * NUM_T              # plan_num after cat(Tception1, Tception2) on dim=1
T_LEN = 128                   # time samples per trial (small for the demo)
BATCH = 2
BN_EPS = 1e-5
POOL_K, POOL_S = 16, 8        # AvgPool2d((1,16), stride=(1,8))

WIN1 = int(0.5 * SAMPLING_RATE)     # 500, Tception1 kernel, padding 250
WIN2 = int(0.25 * SAMPLING_RATE)    # 250, Tception2 kernel, padding 125
PAD1, PAD2 = 250, 125
FEAT = PLAN * 3                     # LSTM input size (plan_num * 3 spatial rows)
HIDDEN = FEAT // 2                  # LSTM hidden size


def _sigmoid(x):
    # single EUP op per gate (tanh), instead of exp + add + divide
    return 0.5 * (jnp.tanh(0.5 * x) + 1.0)


# ---------------------------------------------------------------------------
# The single fused kernel.  All shapes are static and derived from the refs.
#   x_ref    : (B*C, T)             raw signal, rows = (b, c)
#   wtoe_ref : (T, PLAN*tc)         Toeplitz conv weight, cols = (p, t)
#   btoe_ref : (1, PLAN*tc)         conv bias broadcast over t
#   wleft_ref: (B*F, PLAN*B*C)      fused Sception1+2 weight, block-diag over batch
#   bsc_ref  : (1, B*F)             fused Sception bias, cols = (b, f=q*3+h)
#   pool_ref : (n_pool, tc)         shared AvgPool(16,8) weight
#   mavg_ref : (B*F, B*F)           BN per-q averaging matrix (1/cnt where q matches)
#   wih_ref  : (B*F, 4*B*H)         LSTM W_ih, gates i|f|g|o, block-diag over batch
#   bg_ref   : (1, 4*B*H)           LSTM bias (b_ih + b_hh), replicated over batch
#   whh_ref  : (B*H, 4*B*H)         LSTM W_hh, block-diag over batch
#   wlin_ref : (B*H, B), blin_ref (1, B)
#   out_ref  : (1, B)
# ---------------------------------------------------------------------------
def _fused_kernel(x_ref, wtoe_ref, btoe_ref, wleft_ref, bsc_ref, pool_ref,
                  mavg_ref, wih_ref, bg_ref, whh_ref, wlin_ref, blin_ref, out_ref):
    f32 = jnp.float32
    n_pool, tc = pool_ref.shape
    plan = wtoe_ref.shape[1] // tc
    bh = whh_ref.shape[0]                       # batch * hidden

    # ---- Tception1 + Tception2: Conv2d(1,num_T,(1,win)) as one Toeplitz matmul + ReLU
    conv = jnp.dot(x_ref[...], wtoe_ref[...],
                   preferred_element_type=f32) + btoe_ref[...]
    relu = jnp.maximum(conv, 0.0)               # (B*C, plan*tc), cols (p, t)

    # ---- Sception1 + Sception2 (channel-mixing conv) applied BEFORE the pool
    #      (they commute: the conv mixes (p,c), the pool mixes t).  The lane-aligned
    #      128-wide per-plan blocks are restacked along sublanes (pure vreg relabel),
    #      so the two spatial heads collapse into one dense matmul.
    rstack = jnp.concatenate(
        [relu[:, p * tc:(p + 1) * tc] for p in range(plan)], axis=0)   # (plan*B*C, tc)
    s_ft = jnp.dot(wleft_ref[...], rstack,
                   preferred_element_type=f32)                          # (B*F, tc)

    # ---- AvgPool2d((1,16),(1,8)) over t -> w (rows become time), + bias, ReLU ----
    z = lax.dot_general(pool_ref[...], s_ft,
                        dimension_numbers=(((1,), (1,)), ((), ())),
                        preferred_element_type=f32)                     # (n_pool, B*F)
    z = jnp.maximum(z + bsc_ref[...], 0.0)

    # ---- BatchNorm2d(plan): training-mode batch stats, gamma=1 / beta=0; pow; log ----
    # TODO(synk): a trained eval-mode model would use running stats + learned affine.
    s1 = jnp.sum(z, axis=0, keepdims=True)                              # (1, B*F)
    s2 = jnp.sum(z * z, axis=0, keepdims=True)
    mean = jnp.dot(s1, mavg_ref[...], preferred_element_type=f32)
    msq = jnp.dot(s2, mavg_ref[...], preferred_element_type=f32)
    inv = lax.rsqrt(msq - mean * mean + BN_EPS)
    y = (z - mean) * inv
    y = jnp.log(y * y)            # torch.pow(out, 2); torch.log(out) (can hit -inf at 0,
                                  # exactly like the PyTorch reference)
    # TODO(synk): nn.Dropout applied as identity (eval semantics); train-mode RNG not reproduced.

    # ---- LSTM (batch_first, 1 layer): batch folded into lanes, input projection
    #      hoisted out of the recurrence, 15-step recurrence fully unrolled ----
    gin = jnp.dot(y, wih_ref[...], preferred_element_type=f32) + bg_ref[...]  # (n_pool, 4*bh)
    whh = whh_ref[...]
    h = jnp.zeros((1, bh), f32)
    c = jnp.zeros((1, bh), f32)
    for w in range(n_pool):
        g = gin[w:w + 1, :] + jnp.dot(h, whh, preferred_element_type=f32)     # (1, 4*bh)
        ig = _sigmoid(g[:, 0 * bh:1 * bh])
        fg = _sigmoid(g[:, 1 * bh:2 * bh])
        gg = jnp.tanh(g[:, 2 * bh:3 * bh])
        og = _sigmoid(g[:, 3 * bh:4 * bh])
        c = fg * c + ig * gg
        h = og * jnp.tanh(c)

    # ---- Linear(H, 1) + ReLU on the last hidden state; block-diag weight gives (1, B) ----
    pred = jnp.dot(h, wlin_ref[...], preferred_element_type=f32) + blin_ref[...]
    out_ref[...] = jnp.maximum(pred, 0.0)


# ---------------------------------------------------------------------------
# Host-side (NumPy) weight packing: called ONCE per parameter set, outside jit.
# ---------------------------------------------------------------------------
def pack_params(p, *, T, batch, chn):
    plan, F, H = PLAN, FEAT, HIDDEN
    t_out = T + 2 * PAD1 - WIN1 + 1
    assert t_out == T + 2 * PAD2 - WIN2 + 1, "branch widths must match (pad == win/2)"
    n_pool = (t_out - POOL_K) // POOL_S + 1
    assert n_pool >= 1
    t_used = POOL_S * (n_pool - 1) + POOL_K        # conv columns actually read by the pool
    tc = ((t_used + 127) // 128) * 128             # pad for lane-aligned per-plan blocks

    # -- Toeplitz conv weight (signal zero-padding folded in), cols = (p, t) --
    def toe(w, pad):
        w = np.asarray(w, np.float32)              # (num_T, win)
        win = w.shape[1]
        s = np.arange(T)[:, None]
        t = np.arange(tc)[None, :]
        k = s - t + pad                            # filter tap hit by sample s at output t
        valid = (k >= 0) & (k < win) & (t < t_used)
        g = w.T[np.clip(k, 0, win - 1)]            # (T, tc, num_T)
        return np.where(valid[..., None], g, 0.0)

    toe_all = np.concatenate([toe(p["t1_w"], PAD1), toe(p["t2_w"], PAD2)], axis=-1)
    wtoe = np.ascontiguousarray(toe_all.transpose(0, 2, 1)).reshape(T, plan * tc)
    wtoe = wtoe.astype(np.float32)
    bias_t = np.concatenate([np.asarray(p["t1_b"]), np.asarray(p["t2_b"])]).astype(np.float32)
    btoe = np.repeat(bias_t, tc).reshape(1, plan * tc)

    # -- shared AvgPool(16, 8) weight: (n_pool, tc) --
    tt = np.arange(tc)[None, :]
    w0 = (POOL_S * np.arange(n_pool))[:, None]
    pool = (((tt >= w0) & (tt < w0 + POOL_K)).astype(np.float32)) / POOL_K

    # -- fused Sception1 + Sception2 weight, block-diagonal over batch --
    s1_w = np.asarray(p["s1_w"], np.float32)       # (plan, plan, chn)   [q, p, c]
    s2_w = np.asarray(p["s2_w"], np.float32)       # (plan, plan, chn//2)
    kh2 = chn // 2
    wsc_feat = np.zeros((plan, chn, F), np.float32)          # [p, c, f], f = q*3 + h
    for q in range(plan):
        wsc_feat[:, :, q * 3 + 0] = s1_w[q]
        wsc_feat[:, 0:kh2, q * 3 + 1] = s2_w[q]
        wsc_feat[:, kh2:chn, q * 3 + 2] = s2_w[q]
    wleft = np.zeros((batch * F, plan * batch * chn), np.float32)
    for b in range(batch):
        for pp in range(plan):
            wleft[b * F:(b + 1) * F,
                  pp * batch * chn + b * chn: pp * batch * chn + (b + 1) * chn] = wsc_feat[pp].T
    bsc_q = np.stack([np.asarray(p["s1_b"]), np.asarray(p["s2_b"]),
                      np.asarray(p["s2_b"])], axis=1).astype(np.float32)   # (plan, 3)
    bsc = np.tile(bsc_q.reshape(1, F), (1, batch))                          # (1, B*F)

    # -- BN per-channel (q) averaging matrix over (b, h, w) --
    qidx = np.tile(np.repeat(np.arange(plan), 3), batch)      # q of each (b, q, h) column
    cnt = float(batch * 3 * n_pool)
    mavg = (qidx[:, None] == qidx[None, :]).astype(np.float32) / cnt

    # -- LSTM (PyTorch gate order i|f|g|o), block-diagonal over batch --
    wih_t = np.asarray(p["wih"], np.float32)       # (4H, F)
    whh_t = np.asarray(p["whh"], np.float32)       # (4H, H)
    bsum = (np.asarray(p["bih"]) + np.asarray(p["bhh"])).astype(np.float32)
    BH = batch * H
    wih = np.zeros((batch * F, 4 * BH), np.float32)
    whh = np.zeros((BH, 4 * BH), np.float32)
    bg = np.zeros((1, 4 * BH), np.float32)
    for gate in range(4):
        for b in range(batch):
            wih[b * F:(b + 1) * F,
                gate * BH + b * H: gate * BH + (b + 1) * H] = wih_t[gate * H:(gate + 1) * H, :].T
            whh[b * H:(b + 1) * H,
                gate * BH + b * H: gate * BH + (b + 1) * H] = whh_t[gate * H:(gate + 1) * H, :].T
            bg[0, gate * BH + b * H: gate * BH + (b + 1) * H] = bsum[gate * H:(gate + 1) * H]

    # -- Linear(H, 1), block-diagonal over batch -> kernel writes (1, B) directly --
    wlin_t = np.asarray(p["wlin"], np.float32)     # (1, H)
    wlin = np.zeros((BH, batch), np.float32)
    for b in range(batch):
        wlin[b * H:(b + 1) * H, b] = wlin_t[0]
    blin = np.full((1, batch), float(np.asarray(p["blin"]).reshape(-1)[0]), np.float32)

    packed = (wtoe, btoe, wleft, bsc, pool, mavg, wih, bg, whh, wlin, blin)
    return tuple(jnp.asarray(a) for a in packed)


# ---------------------------------------------------------------------------
# Forward wrapper: only the pallas_call lives inside jit.
# ---------------------------------------------------------------------------
def _spec(arr):
    nd = arr.ndim
    return pl.BlockSpec(arr.shape, lambda i, _nd=nd: (0,) * _nd)


def tsception_small_forward(x, packed):
    # torch.squeeze(x, dim=0)
    if x.shape[0] == 1:
        x = x[0]
    B, _, C, T = x.shape
    x2d = x.reshape(B * C, T).astype(jnp.float32)

    operands = (x2d,) + tuple(packed)
    out = pl.pallas_call(
        _fused_kernel,
        out_shape=jax.ShapeDtypeStruct((1, B), jnp.float32),
        grid=(1,),
        in_specs=[_spec(a) for a in operands],
        out_specs=pl.BlockSpec((1, B), lambda i: (0, 0)),
        compiler_params=pltpu.CompilerParams(dimension_semantics=("arbitrary",)),
    )(*operands)
    # torch.squeeze(pred); torch.unsqueeze(pred, dim=0) -> (1, B)
    return out


# ---------------------------------------------------------------------------
# Deterministic parameter initialization (shapes from the module's __init__)
# ---------------------------------------------------------------------------
def init_params(key):
    ks = jax.random.split(key, 14)

    def n(k, shape, scale):
        return (scale * jax.random.normal(k, shape)).astype(jnp.float32)

    H, F = HIDDEN, FEAT
    return {
        # Tception convs: Conv2d(1, NUM_T, (1, win)) -> weight (NUM_T, win)
        "t1_w": n(ks[0], (NUM_T, WIN1), 0.05), "t1_b": n(ks[1], (NUM_T,), 0.05),
        "t2_w": n(ks[2], (NUM_T, WIN2), 0.05), "t2_b": n(ks[3], (NUM_T,), 0.05),
        # Sception convs: (out_q, in_p, kernel_rows)
        "s1_w": n(ks[4], (PLAN, PLAN, CHN), 0.1), "s1_b": n(ks[5], (PLAN,), 0.1),
        "s2_w": n(ks[6], (PLAN, PLAN, CHN // 2), 0.1), "s2_b": n(ks[7], (PLAN,), 0.1),
        # LSTM (PyTorch layout, gate order i|f|g|o stacked along rows)
        "wih": n(ks[8], (4 * H, F), 0.2), "whh": n(ks[9], (4 * H, H), 0.2),
        "bih": n(ks[10], (4 * H,), 0.1), "bhh": n(ks[11], (4 * H,), 0.1),
        # Linear(H, 1)
        "wlin": n(ks[12], (1, H), 0.3), "blin": n(ks[13], (1,), 0.1),
    }


if __name__ == "__main__":
    key = jax.random.PRNGKey(0)
    kp, kx = jax.random.split(key)
    params = init_params(kp)
    x = jax.random.normal(kx, (BATCH, 1, CHN, T_LEN), dtype=jnp.float32)

    # Weight packing happens once, on the host, outside the jitted per-call path.
    packed = pack_params(params, T=T_LEN, batch=BATCH, chn=CHN)

    fwd = jax.jit(tsception_small_forward)
    out = fwd(x, packed)
    jax.block_until_ready(out)
    assert out.shape == (1, BATCH), out.shape
    print("KERNEL_OK")
</pallas_src>

<mosaic_0001>
module attributes {stable_mosaic.version = 11 : i64} {
  func.func @_fused_kernel(%arg0: i32, %arg1: memref<8x128xf32, #tpu.memory_space<vmem>>, %arg2: memref<128x1024xf32, #tpu.memory_space<vmem>>, %arg3: memref<1x1024xf32, #tpu.memory_space<vmem>>, %arg4: memref<48x64xf32, #tpu.memory_space<vmem>>, %arg5: memref<1x48xf32, #tpu.memory_space<vmem>>, %arg6: memref<15x128xf32, #tpu.memory_space<vmem>>, %arg7: memref<48x48xf32, #tpu.memory_space<vmem>>, %arg8: memref<48x96xf32, #tpu.memory_space<vmem>>, %arg9: memref<1x96xf32, #tpu.memory_space<vmem>>, %arg10: memref<24x96xf32, #tpu.memory_space<vmem>>, %arg11: memref<24x2xf32, #tpu.memory_space<vmem>>, %arg12: memref<1x2xf32, #tpu.memory_space<vmem>>, %arg13: memref<1x2xf32, #tpu.memory_space<vmem>>) attributes {dimension_semantics = [#tpu.dimension_semantics<arbitrary>], iteration_bounds = array<i64: 1>, scalar_prefetch = 0 : i64, scratch_operands = 0 : i64, tpu.core_type = #tpu.core_type<tc>, window_params = [{pipeline_mode = #tpu.pipeline_mode<synchronous>, transform_indices = @transform_0, window_bounds = array<i64: 8, 128>}, {pipeline_mode = #tpu.pipeline_mode<synchronous>, transform_indices = @transform_1, window_bounds = array<i64: 128, 1024>}, {pipeline_mode = #tpu.pipeline_mode<synchronous>, transform_indices = @transform_2, window_bounds = array<i64: 1, 1024>}, {pipeline_mode = #tpu.pipeline_mode<synchronous>, transform_indices = @transform_3, window_bounds = array<i64: 48, 64>}, {pipeline_mode = #tpu.pipeline_mode<synchronous>, transform_indices = @transform_4, window_bounds = array<i64: 1, 48>}, {pipeline_mode = #tpu.pipeline_mode<synchronous>, transform_indices = @transform_5, window_bounds = array<i64: 15, 128>}, {pipeline_mode = #tpu.pipeline_mode<synchronous>, transform_indices = @transform_6, window_bounds = array<i64: 48, 48>}, {pipeline_mode = #tpu.pipeline_mode<synchronous>, transform_indices = @transform_7, window_bounds = array<i64: 48, 96>}, {pipeline_mode = #tpu.pipeline_mode<synchronous>, transform_indices = @transform_8, window_bounds = array<i64: 1, 96>}, {pipeline_mode = #tpu.pipeline_mode<synchronous>, transform_indices = @transform_9, window_bounds = array<i64: 24, 96>}, {pipeline_mode = #tpu.pipeline_mode<synchronous>, transform_indices = @transform_10, window_bounds = array<i64: 24, 2>}, {pipeline_mode = #tpu.pipeline_mode<synchronous>, transform_indices = @transform_11, window_bounds = array<i64: 1, 2>}, {pipeline_mode = #tpu.pipeline_mode<synchronous>, transform_indices = @transform_12, window_bounds = array<i64: 1, 2>}]} {
    %c0 = arith.constant 0 : index
    %c0_0 = arith.constant 0 : index
    %0 = vector.load %arg1[%c0, %c0_0] : memref<8x128xf32, #tpu.memory_space<vmem>>, vector<8x128xf32>
    %c0_1 = arith.constant 0 : index
    %c0_2 = arith.constant 0 : index
    %1 = vector.load %arg2[%c0_1, %c0_2] : memref<128x1024xf32, #tpu.memory_space<vmem>>, vector<128x1024xf32>
    %cst = arith.constant dense<0.000000e+00> : vector<8x1024xf32>
    %2 = tpu.matmul %0, %1, %cst {dimension_numbers = #tpu.dot_dimension_numbers<[1], [0], [0], [1], [0, 0, 1, 1], [], []>} : vector<8x128xf32>, vector<128x1024xf32>, vector<8x1024xf32> -> vector<8x1024xf32>
    %c0_3 = arith.constant 0 : index
    %c0_4 = arith.constant 0 : index
    %3 = vector.load %arg3[%c0_3, %c0_4] : memref<1x1024xf32, #tpu.memory_space<vmem>>, vector<1x1024xf32>
    %4 = vector.broadcast %3 : vector<1x1024xf32> to vector<8x1024xf32>
    %5 = arith.addf %2, %4 : vector<8x1024xf32>
    %cst_5 = arith.constant 0.000000e+00 : f32
    %6 = vector.broadcast %cst_5 : f32 to vector<8x1024xf32>
    %7 = arith.maximumf %5, %6 : vector<8x1024xf32>
    %8 = vector.extract_strided_slice %7 {offsets = [0, 0], sizes = [8, 128], strides = [1, 1]} : vector<8x1024xf32> to vector<8x128xf32>
    %9 = vector.extract_strided_slice %7 {offsets = [0, 128], sizes = [8, 128], strides = [1, 1]} : vector<8x1024xf32> to vector<8x128xf32>
    %10 = vector.extract_strided_slice %7 {offsets = [0, 256], sizes = [8, 128], strides = [1, 1]} : vector<8x1024xf32> to vector<8x128xf32>
    %11 = vector.extract_strided_slice %7 {offsets = [0, 384], sizes = [8, 128], strides = [1, 1]} : vector<8x1024xf32> to vector<8x128xf32>
    %12 = vector.extract_strided_slice %7 {offsets = [0, 512], sizes = [8, 128], strides = [1, 1]} : vector<8x1024xf32> to vector<8x128xf32>
    %13 = vector.extract_strided_slice %7 {offsets = [0, 640], sizes = [8, 128], strides = [1, 1]} : vector<8x1024xf32> to vector<8x128xf32>
    %14 = vector.extract_strided_slice %7 {offsets = [0, 768], sizes = [8, 128], strides = [1, 1]} : vector<8x1024xf32> to vector<8x128xf32>
    %15 = vector.extract_strided_slice %7 {offsets = [0, 896], sizes = [8, 128], strides = [1, 1]} : vector<8x1024xf32> to vector<8x128xf32>
    %16 = tpu.concatenate %8, %9, %10, %11, %12, %13, %14, %15 in 0 : vector<8x128xf32>, vector<8x128xf32>, vector<8x128xf32>, vector<8x128xf32>, vector<8x128xf32>, vector<8x128xf32>, vector<8x128xf32>, vector<8x128xf32> -> vector<64x128xf32>
    %c0_6 = arith.constant 0 : index
    %c0_7 = arith.constant 0 : index
    %17 = vector.load %arg4[%c0_6, %c0_7] : memref<48x64xf32, #tpu.memory_space<vmem>>, vector<48x64xf32>
    %cst_8 = arith.constant dense<0.000000e+00> : vector<48x128xf32>
    %18 = tpu.matmul %17, %16, %cst_8 {dimension_numbers = #tpu.dot_dimension_numbers<[1], [0], [0], [1], [0, 0, 1, 1], [], []>} : vector<48x64xf32>, vector<64x128xf32>, vector<48x128xf32> -> vector<48x128xf32>
    %c0_9 = arith.constant 0 : index
    %c0_10 = arith.constant 0 : index
    %19 = vector.load %arg6[%c0_9, %c0_10] : memref<15x128xf32, #tpu.memory_space<vmem>>, vector<15x128xf32>
    %cst_11 = arith.constant dense<0.000000e+00> : vector<15x48xf32>
    %20 = tpu.matmul %19, %18, %cst_11 {dimension_numbers = #tpu.dot_dimension_numbers<[1], [1], [0], [0], [0, 0, 1, 0], [], []>} : vector<15x128xf32>, vector<48x128xf32>, vector<15x48xf32> -> vector<15x48xf32>
    %c0_12 = arith.constant 0 : index
    %c0_13 = arith.constant 0 : index
    %21 = vector.load %arg5[%c0_12, %c0_13] : memref<1x48xf32, #tpu.memory_space<vmem>>, vector<1x48xf32>
    %22 = vector.broadcast %21 : vector<1x48xf32> to vector<15x48xf32>
    %23 = arith.addf %20, %22 : vector<15x48xf32>
    %cst_14 = arith.constant 0.000000e+00 : f32
    %24 = vector.broadcast %cst_14 : f32 to vector<15x48xf32>
    %25 = arith.maximumf %23, %24 : vector<15x48xf32>
    %cst_15 = arith.constant dense<0.000000e+00> : vector<48xf32>
    %26 = vector.multi_reduction <add>, %25, %cst_15 [0] : vector<15x48xf32> to vector<48xf32>
    %27 = vector.shape_cast %26 : vector<48xf32> to vector<1x48xf32>
    %28 = arith.mulf %25, %25 : vector<15x48xf32>
    %cst_16 = arith.constant dense<0.000000e+00> : vector<48xf32>
    %29 = vector.multi_reduction <add>, %28, %cst_16 [0] : vector<15x48xf32> to vector<48xf32>
    %30 = vector.shape_cast %29 : vector<48xf32> to vector<1x48xf32>
    %c0_17 = arith.constant 0 : index
    %c0_18 = arith.constant 0 : index
    %31 = vector.load %arg7[%c0_17, %c0_18] : memref<48x48xf32, #tpu.memory_space<vmem>>, vector<48x48xf32>
    %cst_19 = arith.constant dense<0.000000e+00> : vector<1x48xf32>
    %32 = tpu.matmul %27, %31, %cst_19 {dimension_numbers = #tpu.dot_dimension_numbers<[1], [0], [0], [1], [0, 0, 1, 1], [], []>} : vector<1x48xf32>, vector<48x48xf32>, vector<1x48xf32> -> vector<1x48xf32>
    %c0_20 = arith.constant 0 : index
    %c0_21 = arith.constant 0 : index
    %33 = vector.load %arg7[%c0_20, %c0_21] : memref<48x48xf32, #tpu.memory_space<vmem>>, vector<48x48xf32>
    %cst_22 = arith.constant dense<0.000000e+00> : vector<1x48xf32>
    %34 = tpu.matmul %30, %33, %cst_22 {dimension_numbers = #tpu.dot_dimension_numbers<[1], [0], [0], [1], [0, 0, 1, 1], [], []>} : vector<1x48xf32>, vector<48x48xf32>, vector<1x48xf32> -> vector<1x48xf32>
    %35 = arith.mulf %32, %32 : vector<1x48xf32>
    %36 = arith.subf %34, %35 : vector<1x48xf32>
    %cst_23 = arith.constant 9.99999974E-6 : f32
    %37 = vector.broadcast %cst_23 : f32 to vector<1x48xf32>
    %38 = arith.addf %36, %37 : vector<1x48xf32>
    %39 = math.rsqrt %38 : vector<1x48xf32>
    %40 = vector.broadcast %32 : vector<1x48xf32> to vector<15x48xf32>
    %41 = arith.subf %25, %40 : vector<15x48xf32>
    %42 = vector.broadcast %39 : vector<1x48xf32> to vector<15x48xf32>
    %43 = arith.mulf %41, %42 : vector<15x48xf32>
    %44 = arith.mulf %43, %43 : vector<15x48xf32>
    %45 = math.log %44 : vector<15x48xf32>
    %c0_24 = arith.constant 0 : index
    %c0_25 = arith.constant 0 : index
    %46 = vector.load %arg8[%c0_24, %c0_25] : memref<48x96xf32, #tpu.memory_space<vmem>>, vector<48x96xf32>
    %cst_26 = arith.constant dense<0.000000e+00> : vector<15x96xf32>
    %47 = tpu.matmul %45, %46, %cst_26 {dimension_numbers = #tpu.dot_dimension_numbers<[1], [0], [0], [1], [0, 0, 1, 1], [], []>} : vector<15x48xf32>, vector<48x96xf32>, vector<15x96xf32> -> vector<15x96xf32>
    %c0_27 = arith.constant 0 : index
    %c0_28 = arith.constant 0 : index
    %48 = vector.load %arg9[%c0_27, %c0_28] : memref<1x96xf32, #tpu.memory_space<vmem>>, vector<1x96xf32>
    %49 = vector.broadcast %48 : vector<1x96xf32> to vector<15x96xf32>
    %50 = arith.addf %47, %49 : vector<15x96xf32>
    %c0_29 = arith.constant 0 : index
    %c0_30 = arith.constant 0 : index
    %51 = vector.load %arg10[%c0_29, %c0_30] : memref<24x96xf32, #tpu.memory_space<vmem>>, vector<24x96xf32>
    %cst_31 = arith.constant 0.000000e+00 : f32
    %52 = vector.broadcast %cst_31 : f32 to vector<1x24xf32>
    %cst_32 = arith.constant 0.000000e+00 : f32
    %53 = vector.broadcast %cst_32 : f32 to vector<1x24xf32>
    %54 = vector.extract_strided_slice %50 {offsets = [0, 0], sizes = [1, 96], strides = [1, 1]} : vector<15x96xf32> to vector<1x96xf32>
    %cst_33 = arith.constant dense<0.000000e+00> : vector<1x96xf32>
    %55 = tpu.matmul %52, %51, %cst_33 {dimension_numbers = #tpu.dot_dimension_numbers<[1], [0], [0], [1], [0, 0, 1, 1], [], []>} : vector<1x24xf32>, vector<24x96xf32>, vector<1x96xf32> -> vector<1x96xf32>
    %56 = arith.addf %54, %55 : vector<1x96xf32>
    %57 = vector.extract_strided_slice %56 {offsets = [0, 0], sizes = [1, 24], strides = [1, 1]} : vector<1x96xf32> to vector<1x24xf32>
    %cst_34 = arith.constant 5.000000e-01 : f32
    %58 = vector.broadcast %cst_34 : f32 to vector<1x24xf32>
    %59 = arith.mulf %58, %57 : vector<1x24xf32>
    %60 = math.tanh %59 : vector<1x24xf32>
    %cst_35 = arith.constant 1.000000e+00 : f32
    %61 = vector.broadcast %cst_35 : f32 to vector<1x24xf32>
    %62 = arith.addf %60, %61 : vector<1x24xf32>
    %cst_36 = arith.constant 5.000000e-01 : f32
    %63 = vector.broadcast %cst_36 : f32 to vector<1x24xf32>
    %64 = arith.mulf %63, %62 : vector<1x24xf32>
    %65 = vector.extract_strided_slice %56 {offsets = [0, 24], sizes = [1, 24], strides = [1, 1]} : vector<1x96xf32> to vector<1x24xf32>
    %cst_37 = arith.constant 5.000000e-01 : f32
    %66 = vector.broadcast %cst_37 : f32 to vector<1x24xf32>
    %67 = arith.mulf %66, %65 : vector<1x24xf32>
    %68 = math.tanh %67 : vector<1x24xf32>
    %cst_38 = arith.constant 1.000000e+00 : f32
    %69 = vector.broadcast %cst_38 : f32 to vector<1x24xf32>
    %70 = arith.addf %68, %69 : vector<1x24xf32>
    %cst_39 = arith.constant 5.000000e-01 : f32
    %71 = vector.broadcast %cst_39 : f32 to vector<1x24xf32>
    %72 = arith.mulf %71, %70 : vector<1x24xf32>
    %73 = vector.extract_strided_slice %56 {offsets = [0, 48], sizes = [1, 24], strides = [1, 1]} : vector<1x96xf32> to vector<1x24xf32>
    %74 = math.tanh %73 : vector<1x24xf32>
    %75 = vector.extract_strided_slice %56 {offsets = [0, 72], sizes = [1, 24], strides = [1, 1]} : vector<1x96xf32> to vector<1x24xf32>
    %cst_40 = arith.constant 5.000000e-01 : f32
    %76 = vector.broadcast %cst_40 : f32 to vector<1x24xf32>
    %77 = arith.mulf %76, %75 : vector<1x24xf32>
    %78 = math.tanh %77 : vector<1x24xf32>
    %cst_41 = arith.constant 1.000000e+00 : f32
    %79 = vector.broadcast %cst_41 : f32 to vector<1x24xf32>
    %80 = arith.addf %78, %79 : vector<1x24xf32>
    %cst_42 = arith.constant 5.000000e-01 : f32
    %81 = vector.broadcast %cst_42 : f32 to vector<1x24xf32>
    %82 = arith.mulf %81, %80 : vector<1x24xf32>
    %83 = arith.mulf %72, %53 : vector<1x24xf32>
    %84 = arith.mulf %64, %74 : vector<1x24xf32>
    %85 = arith.addf %83, %84 : vector<1x24xf32>
    %86 = math.tanh %85 : vector<1x24xf32>
    %87 = arith.mulf %82, %86 : vector<1x24xf32>
    %88 = vector.extract_strided_slice %50 {offsets = [1, 0], sizes = [1, 96], strides = [1, 1]} : vector<15x96xf32> to vector<1x96xf32>
    %cst_43 = arith.constant dense<0.000000e+00> : vector<1x96xf32>
    %89 = tpu.matmul %87, %51, %cst_43 {dimension_numbers = #tpu.dot_dimension_numbers<[1], [0], [0], [1], [0, 0, 1, 1], [], []>} : vector<1x24xf32>, vector<24x96xf32>, vector<1x96xf32> -> vector<1x96xf32>
    %90 = arith.addf %88, %89 : vector<1x96xf32>
    %91 = vector.extract_strided_slice %90 {offsets = [0, 0], sizes = [1, 24], strides = [1, 1]} : vector<1x96xf32> to vector<1x24xf32>
    %cst_44 = arith.constant 5.000000e-01 : f32
    %92 = vector.broadcast %cst_44 : f32 to vector<1x24xf32>
    %93 = arith.mulf %92, %91 : vector<1x24xf32>
    %94 = math.tanh %93 : vector<1x24xf32>
    %cst_45 = arith.constant 1.000000e+00 : f32
    %95 = vector.broadcast %cst_45 : f32 to vector<1x24xf32>
    %96 = arith.addf %94, %95 : vector<1x24xf32>
    %cst_46 = arith.constant 5.000000e-01 : f32
    %97 = vector.broadcast %cst_46 : f32 to vector<1x24xf32>
    %98 = arith.mulf %97, %96 : vector<1x24xf32>
    %99 = vector.extract_strided_slice %90 {offsets = [0, 24], sizes = [1, 24], strides = [1, 1]} : vector<1x96xf32> to vector<1x24xf32>
    %cst_47 = arith.constant 5.000000e-01 : f32
    %100 = vector.broadcast %cst_47 : f32 to vector<1x24xf32>
    %101 = arith.mulf %100, %99 : vector<1x24xf32>
    %102 = math.tanh %101 : vector<1x24xf32>
    %cst_48 = arith.constant 1.000000e+00 : f32
    %103 = vector.broadcast %cst_48 : f32 to vector<1x24xf32>
    %104 = arith.addf %102, %103 : vector<1x24xf32>
    %cst_49 = arith.constant 5.000000e-01 : f32
    %105 = vector.broadcast %cst_49 : f32 to vector<1x24xf32>
    %106 = arith.mulf %105, %104 : vector<1x24xf32>
    %107 = vector.extract_strided_slice %90 {offsets = [0, 48], sizes = [1, 24], strides = [1, 1]} : vector<1x96xf32> to vector<1x24xf32>
    %108 = math.tanh %107 : vector<1x24xf32>
    %109 = vector.extract_strided_slice %90 {offsets = [0, 72], sizes = [1, 24], strides = [1, 1]} : vector<1x96xf32> to vector<1x24xf32>
    %cst_50 = arith.constant 5.000000e-01 : f32
    %110 = vector.broadcast %cst_50 : f32 to vector<1x24xf32>
    %111 = arith.mulf %110, %109 : vector<1x24xf32>
    %112 = math.tanh %111 : vector<1x24xf32>
    %cst_51 = arith.constant 1.000000e+00 : f32
    %113 = vector.broadcast %cst_51 : f32 to vector<1x24xf32>
    %114 = arith.addf %112, %113 : vector<1x24xf32>
    %cst_52 = arith.constant 5.000000e-01 : f32
    %115 = vector.broadcast %cst_52 : f32 to vector<1x24xf32>
    %116 = arith.mulf %115, %114 : vector<1x24xf32>
    %117 = arith.mulf %106, %85 : vector<1x24xf32>
    %118 = arith.mulf %98, %108 : vector<1x24xf32>
    %119 = arith.addf %117, %118 : vector<1x24xf32>
    %120 = math.tanh %119 : vector<1x24xf32>
    %121 = arith.mulf %116, %120 : vector<1x24xf32>
    %122 = vector.extract_strided_slice %50 {offsets = [2, 0], sizes = [1, 96], strides = [1, 1]} : vector<15x96xf32> to vector<1x96xf32>
    %cst_53 = arith.constant dense<0.000000e+00> : vector<1x96xf32>
    %123 = tpu.matmul %121, %51, %cst_53 {dimension_numbers = #tpu.dot_dimension_numbers<[1], [0], [0], [1], [0, 0, 1, 1], [], []>} : vector<1x24xf32>, vector<24x96xf32>, vector<1x96xf32> -> vector<1x96xf32>
    %124 = arith.addf %122, %123 : vector<1x96xf32>
    %125 = vector.extract_strided_slice %124 {offsets = [0, 0], sizes = [1, 24], strides = [1, 1]} : vector<1x96xf32> to vector<1x24xf32>
    %cst_54 = arith.constant 5.000000e-01 : f32
    %126 = vector.broadcast %cst_54 : f32 to vector<1x24xf32>
    %127 = arith.mulf %126, %125 : vector<1x24xf32>
    %128 = math.tanh %127 : vector<1x24xf32>
    %cst_55 = arith.constant 1.000000e+00 : f32
    %129 = vector.broadcast %cst_55 : f32 to vector<1x24xf32>
    %130 = arith.addf %128, %129 : vector<1x24xf32>
    %cst_56 = arith.constant 5.000000e-01 : f32
    %131 = vector.broadcast %cst_56 : f32 to vector<1x24xf32>
    %132 = arith.mulf %131, %130 : vector<1x24xf32>
    %133 = vector.extract_strided_slice %124 {offsets = [0, 24], sizes = [1, 24], strides = [1, 1]} : vector<1x96xf32> to vector<1x24xf32>
    %cst_57 = arith.constant 5.000000e-01 : f32
    %134 = vector.broadcast %cst_57 : f32 to vector<1x24xf32>
    %135 = arith.mulf %134, %133 : vector<1x24xf32>
    %136 = math.tanh %135 : vector<1x24xf32>
    %cst_58 = arith.constant 1.000000e+00 : f32
    %137 = vector.broadcast %cst_58 : f32 to vector<1x24xf32>
    %138 = arith.addf %136, %137 : vector<1x24xf32>
    %cst_59 = arith.constant 5.000000e-01 : f32
    %139 = vector.broadcast %cst_59 : f32 to vector<1x24xf32>
    %140 = arith.mulf %139, %138 : vector<1x24xf32>
    %141 = vector.extract_strided_slice %124 {offsets = [0, 48], sizes = [1, 24], strides = [1, 1]} : vector<1x96xf32> to vector<1x24xf32>
    %142 = math.tanh %141 : vector<1x24xf32>
    %143 = vector.extract_strided_slice %124 {offsets = [0, 72], sizes = [1, 24], strides = [1, 1]} : vector<1x96xf32> to vector<1x24xf32>
    %cst_60 = arith.constant 5.000000e-01 : f32
    %144 = vector.broadcast %cst_60 : f32 to vector<1x24xf32>
    %145 = arith.mulf %144, %143 : vector<1x24xf32>
    %146 = math.tanh %145 : vector<1x24xf32>
    %cst_61 = arith.constant 1.000000e+00 : f32
    %147 = vector.broadcast %cst_61 : f32 to vector<1x24xf32>
    %148 = arith.addf %146, %147 : vector<1x24xf32>
    %cst_62 = arith.constant 5.000000e-01 : f32
    %149 = vector.broadcast %cst_62 : f32 to vector<1x24xf32>
    %150 = arith.mulf %149, %148 : vector<1x24xf32>
    %151 = arith.mulf %140, %119 : vector<1x24xf32>
    %152 = arith.mulf %132, %142 : vector<1x24xf32>
    %153 = arith.addf %151, %152 : vector<1x24xf32>
    %154 = math.tanh %153 : vector<1x24xf32>
    %155 = arith.mulf %150, %154 : vector<1x24xf32>
    %156 = vector.extract_strided_slice %50 {offsets = [3, 0], sizes = [1, 96], strides = [1, 1]} : vector<15x96xf32> to vector<1x96xf32>
    %cst_63 = arith.constant dense<0.000000e+00> : vector<1x96xf32>
    %157 = tpu.matmul %155, %51, %cst_63 {dimension_numbers = #tpu.dot_dimension_numbers<[1], [0], [0], [1], [0, 0, 1, 1], [], []>} : vector<1x24xf32>, vector<24x96xf32>, vector<1x96xf32> -> vector<1x96xf32>
    %158 = arith.addf %156, %157 : vector<1x96xf32>
    %159 = vector.extract_strided_slice %158 {offsets = [0, 0], sizes = [1, 24], strides = [1, 1]} : vector<1x96xf32> to vector<1x24xf32>
    %cst_64 = arith.constant 5.000000e-01 : f32
    %160 = vector.broadcast %cst_64 : f32 to vector<1x24xf32>
    %161 = arith.mulf %160, %159 : vector<1x24xf32>
    %162 = math.tanh %161 : vector<1x24xf32>
    %cst_65 = arith.constant 1.000000e+00 : f32
    %163 = vector.broadcast %cst_65 : f32 to vector<1x24xf32>
    %164 = arith.addf %162, %163 : vector<1x24xf32>
    %cst_66 = arith.constant 5.000000e-01 : f32
    %165 = vector.broadcast %cst_66 : f32 to vector<1x24xf32>
    %166 = arith.mulf %165, %164 : vector<1x24xf32>
    %167 = vector.extract_strided_slice %158 {offsets = [0, 24], sizes = [1, 24], strides = [1, 1]} : vector<1x96xf32> to vector<1x24xf32>
    %cst_67 = arith.constant 5.000000e-01 : f32
    %168 = vector.broadcast %cst_67 : f32 to vector<1x24xf32>
    %169 = arith.mulf %168, %167 : vector<1x24xf32>
    %170 = math.tanh %169 : vector<1x24xf32>
    %cst_68 = arith.constant 1.000000e+00 : f32
    %171 = vector.broadcast %cst_68 : f32 to vector<1x24xf32>
    %172 = arith.addf %170, %171 : vector<1x24xf32>
    %cst_69 = arith.constant 5.000000e-01 : f32
    %173 = vector.broadcast %cst_69 : f32 to vector<1x24xf32>
    %174 = arith.mulf %173, %172 : vector<1x24xf32>
    %175 = vector.extract_strided_slice %158 {offsets = [0, 48], sizes = [1, 24], strides = [1, 1]} : vector<1x96xf32> to vector<1x24xf32>
    %176 = math.tanh %175 : vector<1x24xf32>
    %177 = vector.extract_strided_slice %158 {offsets = [0, 72], sizes = [1, 24], strides = [1, 1]} : vector<1x96xf32> to vector<1x24xf32>
    %cst_70 = arith.constant 5.000000e-01 : f32
    %178 = vector.broadcast %cst_70 : f32 to vector<1x24xf32>
    %179 = arith.mulf %178, %177 : vector<1x24xf32>
    %180 = math.tanh %179 : vector<1x24xf32>
    %cst_71 = arith.constant 1.000000e+00 : f32
    %181 = vector.broadcast %cst_71 : f32 to vector<1x24xf32>
    %182 = arith.addf %180, %181 : vector<1x24xf32>
    %cst_72 = arith.constant 5.000000e-01 : f32
    %183 = vector.broadcast %cst_72 : f32 to vector<1x24xf32>
    %184 = arith.mulf %183, %182 : vector<1x24xf32>
    %185 = arith.mulf %174, %153 : vector<1x24xf32>
    %186 = arith.mulf %166, %176 : vector<1x24xf32>
    %187 = arith.addf %185, %186 : vector<1x24xf32>
    %188 = math.tanh %187 : vector<1x24xf32>
    %189 = arith.mulf %184, %188 : vector<1x24xf32>
    %190 = vector.extract_strided_slice %50 {offsets = [4, 0], sizes = [1, 96], strides = [1, 1]} : vector<15x96xf32> to vector<1x96xf32>
    %cst_73 = arith.constant dense<0.000000e+00> : vector<1x96xf32>
    %191 = tpu.matmul %189, %51, %cst_73 {dimension_numbers = #tpu.dot_dimension_numbers<[1], [0], [0], [1], [0, 0, 1, 1], [], []>} : vector<1x24xf32>, vector<24x96xf32>, vector<1x96xf32> -> vector<1x96xf32>
    %192 = arith.addf %190, %191 : vector<1x96xf32>
    %193 = vector.extract_strided_slice %192 {offsets = [0, 0], sizes = [1, 24], strides = [1, 1]} : vector<1x96xf32> to vector<1x24xf32>
    %cst_74 = arith.constant 5.000000e-01 : f32
    %194 = vector.broadcast %cst_74 : f32 to vector<1x24xf32>
    %195 = arith.mulf %194, %193 : vector<1x24xf32>
    %196 = math.tanh %195 : vector<1x24xf32>
    %cst_75 = arith.constant 1.000000e+00 : f32
    %197 = vector.broadcast %cst_75 : f32 to vector<1x24xf32>
    %198 = arith.addf %196, %197 : vector<1x24xf32>
    %cst_76 = arith.constant 5.000000e-01 : f32
    %199 = vector.broadcast %cst_76 : f32 to vector<1x24xf32>
    %200 = arith.mulf %199, %198 : vector<1x24xf32>
    %201 = vector.extract_strided_slice %192 {offsets = [0, 24], sizes = [1, 24], strides = [1, 1]} : vector<1x96xf32> to vector<1x24xf32>
    %cst_77 = arith.constant 5.000000e-01 : f32
    %202 = vector.broadcast %cst_77 : f32 to vector<1x24xf32>
    %203 = arith.mulf %202, %201 : vector<1x24xf32>
    %204 = math.tanh %203 : vector<1x24xf32>
    %cst_78 = arith.constant 1.000000e+00 : f32
    %205 = vector.broadcast %cst_78 : f32 to vector<1x24xf32>
    %206 = arith.addf %204, %205 : vector<1x24xf32>
    %cst_79 = arith.constant 5.000000e-01 : f32
    %207 = vector.broadcast %cst_79 : f32 to vector<1x24xf32>
    %208 = arith.mulf %207, %206 : vector<1x24xf32>
    %209 = vector.extract_strided_slice %192 {offsets = [0, 48], sizes = [1, 24], strides = [1, 1]} : vector<1x96xf32> to vector<1x24xf32>
    %210 = math.tanh %209 : vector<1x24xf32>
    %211 = vector.extract_strided_slice %192 {offsets = [0, 72], sizes = [1, 24], strides = [1, 1]} : vector<1x96xf32> to vector<1x24xf32>
    %cst_80 = arith.constant 5.000000e-01 : f32
    %212 = vector.broadcast %cst_80 : f32 to vector<1x24xf32>
    %213 = arith.mulf %212, %211 : vector<1x24xf32>
    %214 = math.tanh %213 : vector<1x24xf32>
    %cst_81 = arith.constant 1.000000e+00 : f32
    %215 = vector.broadcast %cst_81 : f32 to vector<1x24xf32>
    %216 = arith.addf %214, %215 : vector<1x24xf32>
    %cst_82 = arith.constant 5.000000e-01 : f32
    %217 = vector.broadcast %cst_82 : f32 to vector<1x24xf32>
    %218 = arith.mulf %217, %216 : vector<1x24xf32>
    %219 = arith.mulf %208, %187 : vector<1x24xf32>
    %220 = arith.mulf %200, %210 : vector<1x24xf32>
    %221 = arith.addf %219, %220 : vector<1x24xf32>
    %222 = math.tanh %221 : vector<1x24xf32>
    %223 = arith.mulf %218, %222 : vector<1x24xf32>
    %224 = vector.extract_strided_slice %50 {offsets = [5, 0], sizes = [1, 96], strides = [1, 1]} : vector<15x96xf32> to vector<1x96xf32>
    %cst_83 = arith.constant dense<0.000000e+00> : vector<1x96xf32>
    %225 = tpu.matmul %223, %51, %cst_83 {dimension_numbers = #tpu.dot_dimension_numbers<[1], [0], [0], [1], [0, 0, 1, 1], [], []>} : vector<1x24xf32>, vector<24x96xf32>, vector<1x96xf32> -> vector<1x96xf32>
    %226 = arith.addf %224, %225 : vector<1x96xf32>
    %227 = vector.extract_strided_slice %226 {offsets = [0, 0], sizes = [1, 24], strides = [1, 1]} : vector<1x96xf32> to vector<1x24xf32>
    %cst_84 = arith.constant 5.000000e-01 : f32
    %228 = vector.broadcast %cst_84 : f32 to vector<1x24xf32>
    %229 = arith.mulf %228, %227 : vector<1x24xf32>
    %230 = math.tanh %229 : vector<1x24xf32>
    %cst_85 = arith.constant 1.000000e+00 : f32
    %231 = vector.broadcast %cst_85 : f32 to vector<1x24xf32>
    %232 = arith.addf %230, %231 : vector<1x24xf32>
    %cst_86 = arith.constant 5.000000e-01 : f32
    %233 = vector.broadcast %cst_86 : f32 to vector<1x24xf32>
    %234 = arith.mulf %233, %232 : vector<1x24xf32>
    %235 = vector.extract_strided_slice %226 {offsets = [0, 24], sizes = [1, 24], strides = [1, 1]} : vector<1x96xf32> to vector<1x24xf32>
    %cst_87 = arith.constant 5.000000e-01 : f32
    %236 = vector.broadcast %cst_87 : f32 to vector<1x24xf32>
    %237 = arith.mulf %236, %235 : vector<1x24xf32>
    %238 = math.tanh %237 : vector<1x24xf32>
    %cst_88 = arith.constant 1.000000e+00 : f32
    %239 = vector.broadcast %cst_88 : f32 to vector<1x24xf32>
    %240 = arith.addf %238, %239 : vector<1x24xf32>
    %cst_89 = arith.constant 5.000000e-01 : f32
    %241 = vector.broadcast %cst_89 : f32 to vector<1x24xf32>
    %242 = arith.mulf %241, %240 : vector<1x24xf32>
    %243 = vector.extract_strided_slice %226 {offsets = [0, 48], sizes = [1, 24], strides = [1, 1]} : vector<1x96xf32> to vector<1x24xf32>
    %244 = math.tanh %243 : vector<1x24xf32>
    %245 = vector.extract_strided_slice %226 {offsets = [0, 72], sizes = [1, 24], strides = [1, 1]} : vector<1x96xf32> to vector<1x24xf32>
    %cst_90 = arith.constant 5.000000e-01 : f32
    %246 = vector.broadcast %cst_90 : f32 to vector<1x24xf32>
    %247 = arith.mulf %246, %245 : vector<1x24xf32>
    %248 = math.tanh %247 : vector<1x24xf32>
    %cst_91 = arith.constant 1.000000e+00 : f32
    %249 = vector.broadcast %cst_91 : f32 to vector<1x24xf32>
    %250 = arith.addf %248, %249 : vector<1x24xf32>
    %cst_92 = arith.constant 5.000000e-01 : f32
    %251 = vector.broadcast %cst_92 : f32 to vector<1x24xf32>
    %252 = arith.mulf %251, %250 : vector<1x24xf32>
    %253 = arith.mulf %242, %221 : vector<1x24xf32>
    %254 = arith.mulf %234, %244 : vector<1x24xf32>
    %255 = arith.addf %253, %254 : vector<1x24xf32>
    %256 = math.tanh %255 : vector<1x24xf32>
    %257 = arith.mulf %252, %256 : vector<1x24xf32>
    %258 = vector.extract_strided_slice %50 {offsets = [6, 0], sizes = [1, 96], strides = [1, 1]} : vector<15x96xf32> to vector<1x96xf32>
    %cst_93 = arith.constant dense<0.000000e+00> : vector<1x96xf32>
    %259 = tpu.matmul %257, %51, %cst_93 {dimension_numbers = #tpu.dot_dimension_numbers<[1], [0], [0], [1], [0, 0, 1, 1], [], []>} : vector<1x24xf32>, vector<24x96xf32>, vector<1x96xf32> -> vector<1x96xf32>
    %260 = arith.addf %258, %259 : vector<1x96xf32>
    %261 = vector.extract_strided_slice %260 {offsets = [0, 0], sizes = [1, 24], strides = [1, 1]} : vector<1x96xf32> to vector<1x24xf32>
    %cst_94 = arith.constant 5.000000e-01 : f32
    %262 = vector.broadcast %cst_94 : f32 to vector<1x24xf32>
    %263 = arith.mulf %262, %261 : vector<1x24xf32>
    %264 = math.tanh %263 : vector<1x24xf32>
    %cst_95 = arith.constant 1.000000e+00 : f32
    %265 = vector.broadcast %cst_95 : f32 to vector<1x24xf32>
    %266 = arith.addf %264, %265 : vector<1x24xf32>
    %cst_96 = arith.constant 5.000000e-01 : f32
    %267 = vector.broadcast %cst_96 : f32 to vector<1x24xf32>
    %268 = arith.mulf %267, %266 : vector<1x24xf32>
    %269 = vector.extract_strided_slice %260 {offsets = [0, 24], sizes = [1, 24], strides = [1, 1]} : vector<1x96xf32> to vector<1x24xf32>
    %cst_97 = arith.constant 5.000000e-01 : f32
    %270 = vector.broadcast %cst_97 : f32 to vector<1x24xf32>
    %271 = arith.mulf %270, %269 : vector<1x24xf32>
    %272 = math.tanh %271 : vector<1x24xf32>
    %cst_98 = arith.constant 1.000000e+00 : f32
    %273 = vector.broadcast %cst_98 : f32 to vector<1x24xf32>
    %274 = arith.addf %272, %273 : vector<1x24xf32>
    %cst_99 = arith.constant 5.000000e-01 : f32
    %275 = vector.broadcast %cst_99 : f32 to vector<1x24xf32>
    %276 = arith.mulf %275, %274 : vector<1x24xf32>
    %277 = vector.extract_strided_slice %260 {offsets = [0, 48], sizes = [1, 24], strides = [1, 1]} : vector<1x96xf32> to vector<1x24xf32>
    %278 = math.tanh %277 : vector<1x24xf32>
    %279 = vector.extract_strided_slice %260 {offsets = [0, 72], sizes = [1, 24], strides = [1, 1]} : vector<1x96xf32> to vector<1x24xf32>
    %cst_100 = arith.constant 5.000000e-01 : f32
    %280 = vector.broadcast %cst_100 : f32 to vector<1x24xf32>
    %281 = arith.mulf %280, %279 : vector<1x24xf32>
    %282 = math.tanh %281 : vector<1x24xf32>
    %cst_101 = arith.constant 1.000000e+00 : f32
    %283 = vector.broadcast %cst_101 : f32 to vector<1x24xf32>
    %284 = arith.addf %282, %283 : vector<1x24xf32>
    %cst_102 = arith.constant 5.000000e-01 : f32
    %285 = vector.broadcast %cst_102 : f32 to vector<1x24xf32>
    %286 = arith.mulf %285, %284 : vector<1x24xf32>
    %287 = arith.mulf %276, %255 : vector<1x24xf32>
    %288 = arith.mulf %268, %278 : vector<1x24xf32>
    %289 = arith.addf %287, %288 : vector<1x24xf32>
    %290 = math.tanh %289 : vector<1x24xf32>
    %291 = arith.mulf %286, %290 : vector<1x24xf32>
    %292 = vector.extract_strided_slice %50 {offsets = [7, 0], sizes = [1, 96], strides = [1, 1]} : vector<15x96xf32> to vector<1x96xf32>
    %cst_103 = arith.constant dense<0.000000e+00> : vector<1x96xf32>
    %293 = tpu.matmul %291, %51, %cst_103 {dimension_numbers = #tpu.dot_dimension_numbers<[1], [0], [0], [1], [0, 0, 1, 1], [], []>} : vector<1x24xf32>, vector<24x96xf32>, vector<1x96xf32> -> vector<1x96xf32>
    %294 = arith.addf %292, %293 : vector<1x96xf32>
    %295 = vector.extract_strided_slice %294 {offsets = [0, 0], sizes = [1, 24], strides = [1, 1]} : vector<1x96xf32> to vector<1x24xf32>
    %cst_104 = arith.constant 5.000000e-01 : f32
    %296 = vector.broadcast %cst_104 : f32 to vector<1x24xf32>
    %297 = arith.mulf %296, %295 : vector<1x24xf32>
    %298 = math.tanh %297 : vector<1x24xf32>
    %cst_105 = arith.constant 1.000000e+00 : f32
    %299 = vector.broadcast %cst_105 : f32 to vector<1x24xf32>
    %300 = arith.addf %298, %299 : vector<1x24xf32>
    %cst_106 = arith.constant 5.000000e-01 : f32
    %301 = vector.broadcast %cst_106 : f32 to vector<1x24xf32>
    %302 = arith.mulf %301, %300 : vector<1x24xf32>
    %303 = vector.extract_strided_slice %294 {offsets = [0, 24], sizes = [1, 24], strides = [1, 1]} : vector<1x96xf32> to vector<1x24xf32>
    %cst_107 = arith.constant 5.000000e-01 : f32
    %304 = vector.broadcast %cst_107 : f32 to vector<1x24xf32>
    %305 = arith.mulf %304, %303 : vector<1x24xf32>
    %306 = math.tanh %305 : vector<1x24xf32>
    %cst_108 = arith.constant 1.000000e+00 : f32
    %307 = vector.broadcast %cst_108 : f32 to vector<1x24xf32>
    %308 = arith.addf %306, %307 : vector<1x24xf32>
    %cst_109 = arith.constant 5.000000e-01 : f32
    %309 = vector.broadcast %cst_109 : f32 to vector<1x24xf32>
    %310 = arith.mulf %309, %308 : vector<1x24xf32>
    %311 = vector.extract_strided_slice %294 {offsets = [0, 48], sizes = [1, 24], strides = [1, 1]} : vector<1x96xf32> to vector<1x24xf32>
    %312 = math.tanh %311 : vector<1x24xf32>
    %313 = vector.extract_strided_slice %294 {offsets = [0, 72], sizes = [1, 24], strides = [1, 1]} : vector<1x96xf32> to vector<1x24xf32>
    %cst_110 = arith.constant 5.000000e-01 : f32
    %314 = vector.broadcast %cst_110 : f32 to vector<1x24xf32>
    %315 = arith.mulf %314, %313 : vector<1x24xf32>
    %316 = math.tanh %315 : vector<1x24xf32>
    %cst_111 = arith.constant 1.000000e+00 : f32
    %317 = vector.broadcast %cst_111 : f32 to vector<1x24xf32>
    %318 = arith.addf %316, %317 : vector<1x24xf32>
    %cst_112 = arith.constant 5.000000e-01 : f32
    %319 = vector.broadcast %cst_112 : f32 to vector<1x24xf32>
    %320 = arith.mulf %319, %318 : vector<1x24xf32>
    %321 = arith.mulf %310, %289 : vector<1x24xf32>
    %322 = arith.mulf %302, %312 : vector<1x24xf32>
    %323 = arith.addf %321, %322 : vector<1x24xf32>
    %324 = math.tanh %323 : vector<1x24xf32>
    %325 = arith.mulf %320, %324 : vector<1x24xf32>
    %326 = vector.extract_strided_slice %50 {offsets = [8, 0], sizes = [1, 96], strides = [1, 1]} : vector<15x96xf32> to vector<1x96xf32>
    %cst_113 = arith.constant dense<0.000000e+00> : vector<1x96xf32>
    %327 = tpu.matmul %325, %51, %cst_113 {dimension_numbers = #tpu.dot_dimension_numbers<[1], [0], [0], [1], [0, 0, 1, 1], [], []>} : vector<1x24xf32>, vector<24x96xf32>, vector<1x96xf32> -> vector<1x96xf32>
    %328 = arith.addf %326, %327 : vector<1x96xf32>
    %329 = vector.extract_strided_slice %328 {offsets = [0, 0], sizes = [1, 24], strides = [1, 1]} : vector<1x96xf32> to vector<1x24xf32>
    %cst_114 = arith.constant 5.000000e-01 : f32
    %330 = vector.broadcast %cst_114 : f32 to vector<1x24xf32>
    %331 = arith.mulf %330, %329 : vector<1x24xf32>
    %332 = math.tanh %331 : vector<1x24xf32>
    %cst_115 = arith.constant 1.000000e+00 : f32
    %333 = vector.broadcast %cst_115 : f32 to vector<1x24xf32>
    %334 = arith.addf %332, %333 : vector<1x24xf32>
    %cst_116 = arith.constant 5.000000e-01 : f32
    %335 = vector.broadcast %cst_116 : f32 to vector<1x24xf32>
    %336 = arith.mulf %335, %334 : vector<1x24xf32>
    %337 = vector.extract_strided_slice %328 {offsets = [0, 24], sizes = [1, 24], strides = [1, 1]} : vector<1x96xf32> to vector<1x24xf32>
    %cst_117 = arith.constant 5.000000e-01 : f32
    %338 = vector.broadcast %cst_117 : f32 to vector<1x24xf32>
    %339 = arith.mulf %338, %337 : vector<1x24xf32>
    %340 = math.tanh %339 : vector<1x24xf32>
    %cst_118 = arith.constant 1.000000e+00 : f32
    %341 = vector.broadcast %cst_118 : f32 to vector<1x24xf32>
    %342 = arith.addf %340, %341 : vector<1x24xf32>
    %cst_119 = arith.constant 5.000000e-01 : f32
    %343 = vector.broadcast %cst_119 : f32 to vector<1x24xf32>
    %344 = arith.mulf %343, %342 : vector<1x24xf32>
    %345 = vector.extract_strided_slice %328 {offsets = [0, 48], sizes = [1, 24], strides = [1, 1]} : vector<1x96xf32> to vector<1x24xf32>
    %346 = math.tanh %345 : vector<1x24xf32>
    %347 = vector.extract_strided_slice %328 {offsets = [0, 72], sizes = [1, 24], strides = [1, 1]} : vector<1x96xf32> to vector<1x24xf32>
    %cst_120 = arith.constant 5.000000e-01 : f32
    %348 = vector.broadcast %cst_120 : f32 to vector<1x24xf32>
    %349 = arith.mulf %348, %347 : vector<1x24xf32>
    %350 = math.tanh %349 : vector<1x24xf32>
    %cst_121 = arith.constant 1.000000e+00 : f32
    %351 = vector.broadcast %cst_121 : f32 to vector<1x24xf32>
    %352 = arith.addf %350, %351 : vector<1x24xf32>
    %cst_122 = arith.constant 5.000000e-01 : f32
    %353 = vector.broadcast %cst_122 : f32 to vector<1x24xf32>
    %354 = arith.mulf %353, %352 : vector<1x24xf32>
    %355 = arith.mulf %344, %323 : vector<1x24xf32>
    %356 = arith.mulf %336, %346 : vector<1x24xf32>
    %357 = arith.addf %355, %356 : vector<1x24xf32>
    %358 = math.tanh %357 : vector<1x24xf32>
    %359 = arith.mulf %354, %358 : vector<1x24xf32>
    %360 = vector.extract_strided_slice %50 {offsets = [9, 0], sizes = [1, 96], strides = [1, 1]} : vector<15x96xf32> to vector<1x96xf32>
    %cst_123 = arith.constant dense<0.000000e+00> : vector<1x96xf32>
    %361 = tpu.matmul %359, %51, %cst_123 {dimension_numbers = #tpu.dot_dimension_numbers<[1], [0], [0], [1], [0, 0, 1, 1], [], []>} : vector<1x24xf32>, vector<24x96xf32>, vector<1x96xf32> -> vector<1x96xf32>
    %362 = arith.addf %360, %361 : vector<1x96xf32>
    %363 = vector.extract_strided_slice %362 {offsets = [0, 0], sizes = [1, 24], strides = [1, 1]} : vector<1x96xf32> to vector<1x24xf32>
    %cst_124 = arith.constant 5.000000e-01 : f32
    %364 = vector.broadcast %cst_124 : f32 to vector<1x24xf32>
    %365 = arith.mulf %364, %363 : vector<1x24xf32>
    %366 = math.tanh %365 : vector<1x24xf32>
    %cst_125 = arith.constant 1.000000e+00 : f32
    %367 = vector.broadcast %cst_125 : f32 to vector<1x24xf32>
    %368 = arith.addf %366, %367 : vector<1x24xf32>
    %cst_126 = arith.constant 5.000000e-01 : f32
    %369 = vector.broadcast %cst_126 : f32 to vector<1x24xf32>
    %370 = arith.mulf %369, %368 : vector<1x24xf32>
    %371 = vector.extract_strided_slice %362 {offsets = [0, 24], sizes = [1, 24], strides = [1, 1]} : vector<1x96xf32> to vector<1x24xf32>
    %cst_127 = arith.constant 5.000000e-01 : f32
    %372 = vector.broadcast %cst_127 : f32 to vector<1x24xf32>
    %373 = arith.mulf %372, %371 : vector<1x24xf32>
    %374 = math.tanh %373 : vector<1x24xf32>
    %cst_128 = arith.constant 1.000000e+00 : f32
    %375 = vector.broadcast %cst_128 : f32 to vector<1x24xf32>
    %376 = arith.addf %374, %375 : vector<1x24xf32>
    %cst_129 = arith.constant 5.000000e-01 : f32
    %377 = vector.broadcast %cst_129 : f32 to vector<1x24xf32>
    %378 = arith.mulf %377, %376 : vector<1x24xf32>
    %379 = vector.extract_strided_slice %362 {offsets = [0, 48], sizes = [1, 24], strides = [1, 1]} : vector<1x96xf32> to vector<1x24xf32>
    %380 = math.tanh %379 : vector<1x24xf32>
    %381 = vector.extract_strided_slice %362 {offsets = [0, 72], sizes = [1, 24], strides = [1, 1]} : vector<1x96xf32> to vector<1x24xf32>
    %cst_130 = arith.constant 5.000000e-01 : f32
    %382 = vector.broadcast %cst_130 : f32 to vector<1x24xf32>
    %383 = arith.mulf %382, %381 : vector<1x24xf32>
    %384 = math.tanh %383 : vector<1x24xf32>
    %cst_131 = arith.constant 1.000000e+00 : f32
    %385 = vector.broadcast %cst_131 : f32 to vector<1x24xf32>
    %386 = arith.addf %384, %385 : vector<1x24xf32>
    %cst_132 = arith.constant 5.000000e-01 : f32
    %387 = vector.broadcast %cst_132 : f32 to vector<1x24xf32>
    %388 = arith.mulf %387, %386 : vector<1x24xf32>
    %389 = arith.mulf %378, %357 : vector<1x24xf32>
    %390 = arith.mulf %370, %380 : vector<1x24xf32>
    %391 = arith.addf %389, %390 : vector<1x24xf32>
    %392 = math.tanh %391 : vector<1x24xf32>
    %393 = arith.mulf %388, %392 : vector<1x24xf32>
    %394 = vector.extract_strided_slice %50 {offsets = [10, 0], sizes = [1, 96], strides = [1, 1]} : vector<15x96xf32> to vector<1x96xf32>
    %cst_133 = arith.constant dense<0.000000e+00> : vector<1x96xf32>
    %395 = tpu.matmul %393, %51, %cst_133 {dimension_numbers = #tpu.dot_dimension_numbers<[1], [0], [0], [1], [0, 0, 1, 1], [], []>} : vector<1x24xf32>, vector<24x96xf32>, vector<1x96xf32> -> vector<1x96xf32>
    %396 = arith.addf %394, %395 : vector<1x96xf32>
    %397 = vector.extract_strided_slice %396 {offsets = [0, 0], sizes = [1, 24], strides = [1, 1]} : vector<1x96xf32> to vector<1x24xf32>
    %cst_134 = arith.constant 5.000000e-01 : f32
    %398 = vector.broadcast %cst_134 : f32 to vector<1x24xf32>
    %399 = arith.mulf %398, %397 : vector<1x24xf32>
    %400 = math.tanh %399 : vector<1x24xf32>
    %cst_135 = arith.constant 1.000000e+00 : f32
    %401 = vector.broadcast %cst_135 : f32 to vector<1x24xf32>
    %402 = arith.addf %400, %401 : vector<1x24xf32>
    %cst_136 = arith.constant 5.000000e-01 : f32
    %403 = vector.broadcast %cst_136 : f32 to vector<1x24xf32>
    %404 = arith.mulf %403, %402 : vector<1x24xf32>
    %405 = vector.extract_strided_slice %396 {offsets = [0, 24], sizes = [1, 24], strides = [1, 1]} : vector<1x96xf32> to vector<1x24xf32>
    %cst_137 = arith.constant 5.000000e-01 : f32
    %406 = vector.broadcast %cst_137 : f32 to vector<1x24xf32>
    %407 = arith.mulf %406, %405 : vector<1x24xf32>
    %408 = math.tanh %407 : vector<1x24xf32>
    %cst_138 = arith.constant 1.000000e+00 : f32
    %409 = vector.broadcast %cst_138 : f32 to vector<1x24xf32>
    %410 = arith.addf %408, %409 : vector<1x24xf32>
    %cst_139 = arith.constant 5.000000e-01 : f32
    %411 = vector.broadcast %cst_139 : f32 to vector<1x24xf32>
    %412 = arith.mulf %411, %410 : vector<1x24xf32>
    %413 = vector.extract_strided_slice %396 {offsets = [0, 48], sizes = [1, 24], strides = [1, 1]} : vector<1x96xf32> to vector<1x24xf32>
    %414 = math.tanh %413 : vector<1x24xf32>
    %415 = vector.extract_strided_slice %396 {offsets = [0, 72], sizes = [1, 24], strides = [1, 1]} : vector<1x96xf32> to vector<1x24xf32>
    %cst_140 = arith.constant 5.000000e-01 : f32
    %416 = vector.broadcast %cst_140 : f32 to vector<1x24xf32>
    %417 = arith.mulf %416, %415 : vector<1x24xf32>
    %418 = math.tanh %417 : vector<1x24xf32>
    %cst_141 = arith.constant 1.000000e+00 : f32
    %419 = vector.broadcast %cst_141 : f32 to vector<1x24xf32>
    %420 = arith.addf %418, %419 : vector<1x24xf32>
    %cst_142 = arith.constant 5.000000e-01 : f32
    %421 = vector.broadcast %cst_142 : f32 to vector<1x24xf32>
    %422 = arith.mulf %421, %420 : vector<1x24xf32>
    %423 = arith.mulf %412, %391 : vector<1x24xf32>
    %424 = arith.mulf %404, %414 : vector<1x24xf32>
    %425 = arith.addf %423, %424 : vector<1x24xf32>
    %426 = math.tanh %425 : vector<1x24xf32>
    %427 = arith.mulf %422, %426 : vector<1x24xf32>
    %428 = vector.extract_strided_slice %50 {offsets = [11, 0], sizes = [1, 96], strides = [1, 1]} : vector<15x96xf32> to vector<1x96xf32>
    %cst_143 = arith.constant dense<0.000000e+00> : vector<1x96xf32>
    %429 = tpu.matmul %427, %51, %cst_143 {dimension_numbers = #tpu.dot_dimension_numbers<[1], [0], [0], [1], [0, 0, 1, 1], [], []>} : vector<1x24xf32>, vector<24x96xf32>, vector<1x96xf32> -> vector<1x96xf32>
    %430 = arith.addf %428, %429 : vector<1x96xf32>
    %431 = vector.extract_strided_slice %430 {offsets = [0, 0], sizes = [1, 24], strides = [1, 1]} : vector<1x96xf32> to vector<1x24xf32>
    %cst_144 = arith.constant 5.000000e-01 : f32
    %432 = vector.broadcast %cst_144 : f32 to vector<1x24xf32>
    %433 = arith.mulf %432, %431 : vector<1x24xf32>
    %434 = math.tanh %433 : vector<1x24xf32>
    %cst_145 = arith.constant 1.000000e+00 : f32
    %435 = vector.broadcast %cst_145 : f32 to vector<1x24xf32>
    %436 = arith.addf %434, %435 : vector<1x24xf32>
    %cst_146 = arith.constant 5.000000e-01 : f32
    %437 = vector.broadcast %cst_146 : f32 to vector<1x24xf32>
    %438 = arith.mulf %437, %436 : vector<1x24xf32>
    %439 = vector.extract_strided_slice %430 {offsets = [0, 24], sizes = [1, 24], strides = [1, 1]} : vector<1x96xf32> to vector<1x24xf32>
    %cst_147 = arith.constant 5.000000e-01 : f32
    %440 = vector.broadcast %cst_147 : f32 to vector<1x24xf32>
    %441 = arith.mulf %440, %439 : vector<1x24xf32>
    %442 = math.tanh %441 : vector<1x24xf32>
    %cst_148 = arith.constant 1.000000e+00 : f32
    %443 = vector.broadcast %cst_148 : f32 to vector<1x24xf32>
    %444 = arith.addf %442, %443 : vector<1x24xf32>
    %cst_149 = arith.constant 5.000000e-01 : f32
    %445 = vector.broadcast %cst_149 : f32 to vector<1x24xf32>
    %446 = arith.mulf %445, %444 : vector<1x24xf32>
    %447 = vector.extract_strided_slice %430 {offsets = [0, 48], sizes = [1, 24], strides = [1, 1]} : vector<1x96xf32> to vector<1x24xf32>
    %448 = math.tanh %447 : vector<1x24xf32>
    %449 = vector.extract_strided_slice %430 {offsets = [0, 72], sizes = [1, 24], strides = [1, 1]} : vector<1x96xf32> to vector<1x24xf32>
    %cst_150 = arith.constant 5.000000e-01 : f32
    %450 = vector.broadcast %cst_150 : f32 to vector<1x24xf32>
    %451 = arith.mulf %450, %449 : vector<1x24xf32>
    %452 = math.tanh %451 : vector<1x24xf32>
    %cst_151 = arith.constant 1.000000e+00 : f32
    %453 = vector.broadcast %cst_151 : f32 to vector<1x24xf32>
    %454 = arith.addf %452, %453 : vector<1x24xf32>
    %cst_152 = arith.constant 5.000000e-01 : f32
    %455 = vector.broadcast %cst_152 : f32 to vector<1x24xf32>
    %456 = arith.mulf %455, %454 : vector<1x24xf32>
    %457 = arith.mulf %446, %425 : vector<1x24xf32>
    %458 = arith.mulf %438, %448 : vector<1x24xf32>
    %459 = arith.addf %457, %458 : vector<1x24xf32>
    %460 = math.tanh %459 : vector<1x24xf32>
    %461 = arith.mulf %456, %460 : vector<1x24xf32>
    %462 = vector.extract_strided_slice %50 {offsets = [12, 0], sizes = [1, 96], strides = [1, 1]} : vector<15x96xf32> to vector<1x96xf32>
    %cst_153 = arith.constant dense<0.000000e+00> : vector<1x96xf32>
    %463 = tpu.matmul %461, %51, %cst_153 {dimension_numbers = #tpu.dot_dimension_numbers<[1], [0], [0], [1], [0, 0, 1, 1], [], []>} : vector<1x24xf32>, vector<24x96xf32>, vector<1x96xf32> -> vector<1x96xf32>
    %464 = arith.addf %462, %463 : vector<1x96xf32>
    %465 = vector.extract_strided_slice %464 {offsets = [0, 0], sizes = [1, 24], strides = [1, 1]} : vector<1x96xf32> to vector<1x24xf32>
    %cst_154 = arith.constant 5.000000e-01 : f32
    %466 = vector.broadcast %cst_154 : f32 to vector<1x24xf32>
    %467 = arith.mulf %466, %465 : vector<1x24xf32>
    %468 = math.tanh %467 : vector<1x24xf32>
    %cst_155 = arith.constant 1.000000e+00 : f32
    %469 = vector.broadcast %cst_155 : f32 to vector<1x24xf32>
    %470 = arith.addf %468, %469 : vector<1x24xf32>
    %cst_156 = arith.constant 5.000000e-01 : f32
    %471 = vector.broadcast %cst_156 : f32 to vector<1x24xf32>
    %472 = arith.mulf %471, %470 : vector<1x24xf32>
    %473 = vector.extract_strided_slice %464 {offsets = [0, 24], sizes = [1, 24], strides = [1, 1]} : vector<1x96xf32> to vector<1x24xf32>
    %cst_157 = arith.constant 5.000000e-01 : f32
    %474 = vector.broadcast %cst_157 : f32 to vector<1x24xf32>
    %475 = arith.mulf %474, %473 : vector<1x24xf32>
    %476 = math.tanh %475 : vector<1x24xf32>
    %cst_158 = arith.constant 1.000000e+00 : f32
    %477 = vector.broadcast %cst_158 : f32 to vector<1x24xf32>
    %478 = arith.addf %476, %477 : vector<1x24xf32>
    %cst_159 = arith.constant 5.000000e-01 : f32
    %479 = vector.broadcast %cst_159 : f32 to vector<1x24xf32>
    %480 = arith.mulf %479, %478 : vector<1x24xf32>
    %481 = vector.extract_strided_slice %464 {offsets = [0, 48], sizes = [1, 24], strides = [1, 1]} : vector<1x96xf32> to vector<1x24xf32>
    %482 = math.tanh %481 : vector<1x24xf32>
    %483 = vector.extract_strided_slice %464 {offsets = [0, 72], sizes = [1, 24], strides = [1, 1]} : vector<1x96xf32> to vector<1x24xf32>
    %cst_160 = arith.constant 5.000000e-01 : f32
    %484 = vector.broadcast %cst_160 : f32 to vector<1x24xf32>
    %485 = arith.mulf %484, %483 : vector<1x24xf32>
    %486 = math.tanh %485 : vector<1x24xf32>
    %cst_161 = arith.constant 1.000000e+00 : f32
    %487 = vector.broadcast %cst_161 : f32 to vector<1x24xf32>
    %488 = arith.addf %486, %487 : vector<1x24xf32>
    %cst_162 = arith.constant 5.000000e-01 : f32
    %489 = vector.broadcast %cst_162 : f32 to vector<1x24xf32>
    %490 = arith.mulf %489, %488 : vector<1x24xf32>
    %491 = arith.mulf %480, %459 : vector<1x24xf32>
    %492 = arith.mulf %472, %482 : vector<1x24xf32>
    %493 = arith.addf %491, %492 : vector<1x24xf32>
    %494 = math.tanh %493 : vector<1x24xf32>
    %495 = arith.mulf %490, %494 : vector<1x24xf32>
    %496 = vector.extract_strided_slice %50 {offsets = [13, 0], sizes = [1, 96], strides = [1, 1]} : vector<15x96xf32> to vector<1x96xf32>
    %cst_163 = arith.constant dense<0.000000e+00> : vector<1x96xf32>
    %497 = tpu.matmul %495, %51, %cst_163 {dimension_numbers = #tpu.dot_dimension_numbers<[1], [0], [0], [1], [0, 0, 1, 1], [], []>} : vector<1x24xf32>, vector<24x96xf32>, vector<1x96xf32> -> vector<1x96xf32>
    %498 = arith.addf %496, %497 : vector<1x96xf32>
    %499 = vector.extract_strided_slice %498 {offsets = [0, 0], sizes = [1, 24], strides = [1, 1]} : vector<1x96xf32> to vector<1x24xf32>
    %cst_164 = arith.constant 5.000000e-01 : f32
    %500 = vector.broadcast %cst_164 : f32 to vector<1x24xf32>
    %501 = arith.mulf %500, %499 : vector<1x24xf32>
    %502 = math.tanh %501 : vector<1x24xf32>
    %cst_165 = arith.constant 1.000000e+00 : f32
    %503 = vector.broadcast %cst_165 : f32 to vector<1x24xf32>
    %504 = arith.addf %502, %503 : vector<1x24xf32>
    %cst_166 = arith.constant 5.000000e-01 : f32
    %505 = vector.broadcast %cst_166 : f32 to vector<1x24xf32>
    %506 = arith.mulf %505, %504 : vector<1x24xf32>
    %507 = vector.extract_strided_slice %498 {offsets = [0, 24], sizes = [1, 24], strides = [1, 1]} : vector<1x96xf32> to vector<1x24xf32>
    %cst_167 = arith.constant 5.000000e-01 : f32
    %508 = vector.broadcast %cst_167 : f32 to vector<1x24xf32>
    %509 = arith.mulf %508, %507 : vector<1x24xf32>
    %510 = math.tanh %509 : vector<1x24xf32>
    %cst_168 = arith.constant 1.000000e+00 : f32
    %511 = vector.broadcast %cst_168 : f32 to vector<1x24xf32>
    %512 = arith.addf %510, %511 : vector<1x24xf32>
    %cst_169 = arith.constant 5.000000e-01 : f32
    %513 = vector.broadcast %cst_169 : f32 to vector<1x24xf32>
    %514 = arith.mulf %513, %512 : vector<1x24xf32>
    %515 = vector.extract_strided_slice %498 {offsets = [0, 48], sizes = [1, 24], strides = [1, 1]} : vector<1x96xf32> to vector<1x24xf32>
    %516 = math.tanh %515 : vector<1x24xf32>
    %517 = vector.extract_strided_slice %498 {offsets = [0, 72], sizes = [1, 24], strides = [1, 1]} : vector<1x96xf32> to vector<1x24xf32>
    %cst_170 = arith.constant 5.000000e-01 : f32
    %518 = vector.broadcast %cst_170 : f32 to vector<1x24xf32>
    %519 = arith.mulf %518, %517 : vector<1x24xf32>
    %520 = math.tanh %519 : vector<1x24xf32>
    %cst_171 = arith.constant 1.000000e+00 : f32
    %521 = vector.broadcast %cst_171 : f32 to vector<1x24xf32>
    %522 = arith.addf %520, %521 : vector<1x24xf32>
    %cst_172 = arith.constant 5.000000e-01 : f32
    %523 = vector.broadcast %cst_172 : f32 to vector<1x24xf32>
    %524 = arith.mulf %523, %522 : vector<1x24xf32>
    %525 = arith.mulf %514, %493 : vector<1x24xf32>
    %526 = arith.mulf %506, %516 : vector<1x24xf32>
    %527 = arith.addf %525, %526 : vector<1x24xf32>
    %528 = math.tanh %527 : vector<1x24xf32>
    %529 = arith.mulf %524, %528 : vector<1x24xf32>
    %530 = vector.extract_strided_slice %50 {offsets = [14, 0], sizes = [1, 96], strides = [1, 1]} : vector<15x96xf32> to vector<1x96xf32>
    %cst_173 = arith.constant dense<0.000000e+00> : vector<1x96xf32>
    %531 = tpu.matmul %529, %51, %cst_173 {dimension_numbers = #tpu.dot_dimension_numbers<[1], [0], [0], [1], [0, 0, 1, 1], [], []>} : vector<1x24xf32>, vector<24x96xf32>, vector<1x96xf32> -> vector<1x96xf32>
    %532 = arith.addf %530, %531 : vector<1x96xf32>
    %533 = vector.extract_strided_slice %532 {offsets = [0, 0], sizes = [1, 24], strides = [1, 1]} : vector<1x96xf32> to vector<1x24xf32>
    %cst_174 = arith.constant 5.000000e-01 : f32
    %534 = vector.broadcast %cst_174 : f32 to vector<1x24xf32>
    %535 = arith.mulf %534, %533 : vector<1x24xf32>
    %536 = math.tanh %535 : vector<1x24xf32>
    %cst_175 = arith.constant 1.000000e+00 : f32
    %537 = vector.broadcast %cst_175 : f32 to vector<1x24xf32>
    %538 = arith.addf %536, %537 : vector<1x24xf32>
    %cst_176 = arith.constant 5.000000e-01 : f32
    %539 = vector.broadcast %cst_176 : f32 to vector<1x24xf32>
    %540 = arith.mulf %539, %538 : vector<1x24xf32>
    %541 = vector.extract_strided_slice %532 {offsets = [0, 24], sizes = [1, 24], strides = [1, 1]} : vector<1x96xf32> to vector<1x24xf32>
    %cst_177 = arith.constant 5.000000e-01 : f32
    %542 = vector.broadcast %cst_177 : f32 to vector<1x24xf32>
    %543 = arith.mulf %542, %541 : vector<1x24xf32>
    %544 = math.tanh %543 : vector<1x24xf32>
    %cst_178 = arith.constant 1.000000e+00 : f32
    %545 = vector.broadcast %cst_178 : f32 to vector<1x24xf32>
    %546 = arith.addf %544, %545 : vector<1x24xf32>
    %cst_179 = arith.constant 5.000000e-01 : f32
    %547 = vector.broadcast %cst_179 : f32 to vector<1x24xf32>
    %548 = arith.mulf %547, %546 : vector<1x24xf32>
    %549 = vector.extract_strided_slice %532 {offsets = [0, 48], sizes = [1, 24], strides = [1, 1]} : vector<1x96xf32> to vector<1x24xf32>
    %550 = math.tanh %549 : vector<1x24xf32>
    %551 = vector.extract_strided_slice %532 {offsets = [0, 72], sizes = [1, 24], strides = [1, 1]} : vector<1x96xf32> to vector<1x24xf32>
    %cst_180 = arith.constant 5.000000e-01 : f32
    %552 = vector.broadcast %cst_180 : f32 to vector<1x24xf32>
    %553 = arith.mulf %552, %551 : vector<1x24xf32>
    %554 = math.tanh %553 : vector<1x24xf32>
    %cst_181 = arith.constant 1.000000e+00 : f32
    %555 = vector.broadcast %cst_181 : f32 to vector<1x24xf32>
    %556 = arith.addf %554, %555 : vector<1x24xf32>
    %cst_182 = arith.constant 5.000000e-01 : f32
    %557 = vector.broadcast %cst_182 : f32 to vector<1x24xf32>
    %558 = arith.mulf %557, %556 : vector<1x24xf32>
    %559 = arith.mulf %548, %527 : vector<1x24xf32>
    %560 = arith.mulf %540, %550 : vector<1x24xf32>
    %561 = arith.addf %559, %560 : vector<1x24xf32>
    %562 = math.tanh %561 : vector<1x24xf32>
    %563 = arith.mulf %558, %562 : vector<1x24xf32>
    %c0_183 = arith.constant 0 : index
    %c0_184 = arith.constant 0 : index
    %564 = vector.load %arg11[%c0_183, %c0_184] : memref<24x2xf32, #tpu.memory_space<vmem>>, vector<24x2xf32>
    %cst_185 = arith.constant dense<0.000000e+00> : vector<1x2xf32>
    %565 = tpu.matmul %563, %564, %cst_185 {dimension_numbers = #tpu.dot_dimension_numbers<[1], [0], [0], [1], [0, 0, 1, 1], [], []>} : vector<1x24xf32>, vector<24x2xf32>, vector<1x2xf32> -> vector<1x2xf32>
    %c0_186 = arith.constant 0 : index
    %c0_187 = arith.constant 0 : index
    %566 = vector.load %arg12[%c0_186, %c0_187] : memref<1x2xf32, #tpu.memory_space<vmem>>, vector<1x2xf32>
    %567 = arith.addf %565, %566 : vector<1x2xf32>
    %cst_188 = arith.constant 0.000000e+00 : f32
    %568 = vector.broadcast %cst_188 : f32 to vector<1x2xf32>
    %569 = arith.maximumf %567, %568 : vector<1x2xf32>
    %c0_189 = arith.constant 0 : index
    %c0_190 = arith.constant 0 : index
    %570 = vector.load %arg13[%c0_189, %c0_190] : memref<1x2xf32, #tpu.memory_space<vmem>>, vector<1x2xf32>
    tpu.vector_store %arg13[%c0_189, %c0_190], %569 {strides = array<i32>} : memref<1x2xf32, #tpu.memory_space<vmem>>, vector<1x2xf32>,
    return
  }
  func.func @transform_0(%arg0: i32) -> (i32, i32) {
    %c0_i32 = arith.constant 0 : i32
    %c0_i32_0 = arith.constant 0 : i32
    %c0_i32_1 = arith.constant 0 : i32
    return %c0_i32, %c0_i32_0 : i32, i32
  }
  func.func @transform_1(%arg0: i32) -> (i32, i32) {
    %c0_i32 = arith.constant 0 : i32
    %c0_i32_0 = arith.constant 0 : i32
    %c0_i32_1 = arith.constant 0 : i32
    return %c0_i32, %c0_i32_0 : i32, i32
  }
  func.func @transform_2(%arg0: i32) -> (i32, i32) {
    %c0_i32 = arith.constant 0 : i32
    %c0_i32_0 = arith.constant 0 : i32
    %c0_i32_1 = arith.constant 0 : i32
    return %c0_i32, %c0_i32_0 : i32, i32
  }
  func.func @transform_3(%arg0: i32) -> (i32, i32) {
    %c0_i32 = arith.constant 0 : i32
    %c0_i32_0 = arith.constant 0 : i32
    %c0_i32_1 = arith.constant 0 : i32
    return %c0_i32, %c0_i32_0 : i32, i32
  }
  func.func @transform_4(%arg0: i32) -> (i32, i32) {
    %c0_i32 = arith.constant 0 : i32
    %c0_i32_0 = arith.constant 0 : i32
    %c0_i32_1 = arith.constant 0 : i32
    return %c0_i32, %c0_i32_0 : i32, i32
  }
  func.func @transform_5(%arg0: i32) -> (i32, i32) {
    %c0_i32 = arith.constant 0 : i32
    %c0_i32_0 = arith.constant 0 : i32
    %c0_i32_1 = arith.constant 0 : i32
    return %c0_i32, %c0_i32_0 : i32, i32
  }
  func.func @transform_6(%arg0: i32) -> (i32, i32) {
    %c0_i32 = arith.constant 0 : i32
    %c0_i32_0 = arith.constant 0 : i32
    %c0_i32_1 = arith.constant 0 : i32
    return %c0_i32, %c0_i32_0 : i32, i32
  }
  func.func @transform_7(%arg0: i32) -> (i32, i32) {
    %c0_i32 = arith.constant 0 : i32
    %c0_i32_0 = arith.constant 0 : i32
    %c0_i32_1 = arith.constant 0 : i32
    return %c0_i32, %c0_i32_0 : i32, i32
  }
  func.func @transform_8(%arg0: i32) -> (i32, i32) {
    %c0_i32 = arith.constant 0 : i32
    %c0_i32_0 = arith.constant 0 : i32
    %c0_i32_1 = arith.constant 0 : i32
    return %c0_i32, %c0_i32_0 : i32, i32
  }
  func.func @transform_9(%arg0: i32) -> (i32, i32) {
    %c0_i32 = arith.constant 0 : i32
    %c0_i32_0 = arith.constant 0 : i32
    %c0_i32_1 = arith.constant 0 : i32
    return %c0_i32, %c0_i32_0 : i32, i32
  }
  func.func @transform_10(%arg0: i32) -> (i32, i32) {
    %c0_i32 = arith.constant 0 : i32
    %c0_i32_0 = arith.constant 0 : i32
    %c0_i32_1 = arith.constant 0 : i32
    return %c0_i32, %c0_i32_0 : i32, i32
  }
  func.func @transform_11(%arg0: i32) -> (i32, i32) {
    %c0_i32 = arith.constant 0 : i32
    %c0_i32_0 = arith.constant 0 : i32
    %c0_i32_1 = arith.constant 0 : i32
    return %c0_i32, %c0_i32_0 : i32, i32
  }
  func.func @transform_12(%arg0: i32) -> (i32, i32) {
    %c0_i32 = arith.constant 0 : i32
    %c0_i32_0 = arith.constant 0 : i32
    %c0_i32_1 = arith.constant 0 : i32
    return %c0_i32, %c0_i32_0 : i32, i32
  }
}

</mosaic_0001>

<bundles_post_ra>
// kernel: tsception_small_forward.1
= control target key start
LH: loop header
LB: loop body
LE: loop exit
PB: predicated region body
PF: predicated region fallthrough
CT: control target
= control target key end

     0   :  { %17 = vsyncpa [#allocation3], 0  ;;  %s4134_s0 = inlined_call_operand.hbm [shape: f32[8,128], index: 0, kind: input, shape index: {}]   ;;  %s4135_s1 = inlined_call_operand.hbm [shape: f32[128,1024], index: 1, kind: input, shape index: {}]   ;;  %s4136_s2 = inlined_call_operand.hbm [shape: f32[1,1024], index: 2, kind: input, shape index: {}]   ;;  %s4137_s3 = inlined_call_operand.hbm [shape: f32[48,64], index: 3, kind: input, shape index: {}]   ;;  %s4138_s4 = inlined_call_operand.vmem [shape: f32[1,48], index: 4, kind: input, shape index: {}]   ;;  %s4139_s5 = inlined_call_operand.hbm [shape: f32[15,128], index: 5, kind: input, shape index: {}]   ;;  %s4140_s6 = inlined_call_operand.vmem [shape: f32[48,48], index: 6, kind: input, shape index: {}]   ;;  %s4141_s7 = inlined_call_operand.hbm [shape: f32[48,96], index: 7, kind: input, shape index: {}]   ;;  %s4142_s8 = inlined_call_operand.vmem [shape: f32[1,96], index: 8, kind: input, shape index: {}]   ;;  %s4143_s9 = inlined_call_operand.hbm [shape: f32[24,96], index: 9, kind: input, shape index: {}]   ;;  %s4144_s10 = inlined_call_operand.vmem [shape: f32[24,2], index: 10, kind: input, shape index: {}]   ;;  %s4145_s11 = inlined_call_operand.vmem [shape: f32[1,2], index: 11, kind: input, shape index: {}]   ;;  %s4146_s12 = inlined_call_operand.hbm [shape: f32[1,2], index: 12, kind: output, shape index: {}]  }
   0x1   :  { %18 = vsyncpa [#allocation6], 0 }
   0x2   :  { %19 = vsyncpa [#allocation9], 0 }
   0x3   :  { %20 = vsyncpa [#allocation12], 0 }
   0x4   :  { %21 = vsyncpa [#allocation4], 0  ;;  %s3657_s21 = smov [#allocation5]   ;;  %s3471_s25 = scalar_lea.hbm %s4135_s1, 16384 }
   0x5   :  { %s37_s22 = sshll.u32 %s3657_s21, 4  ;;  %p3472_p0 = scmp.ne.s32.totalorder %s4135_s1, %s3471_s25  ;;  %s38_s22 = int_to_ptr.vmem [resolvable:$true] %s37_s22 }
   0x6   :  { %p3475_p1 = scmp.lt.u32.totalorder %s3471_s25, %s4135_s1 }
   0x8   :  { %p3477_p2 = pnand %p3475_p1, %p3472_p0 }
   0xa   :  { %3480 = shalt.err (!%p3477_p2)
}
   0xb   :  { %s3481_s30 = scalar_lea.vmem %s38_s22, 16384  ;;  %p3486_p4 = scmp.lt.s32.totalorder %s38_s22, %s38_s22 }
   0xc   :  { %p3482_p3 = scmp.ne.s32.totalorder %s38_s22, %s3481_s30  ;;  %p3487_p5 = scmp.lt.s32.totalorder %s3481_s30, %s3481_s30 }
   0xe   :  { %p3488_p6 = por %p3487_p5, %p3486_p4 }
  0x10   :  { %p3489_p7 = pnand %p3488_p6, %p3482_p3 }
  0x12   :  { %3492 = shalt.err (!%p3489_p7)
}
  0x13   :  { %s3658_s13 = smov 1024   ;;  %s3659_s14 = smov 64  }
  0x14   :  { %43 = dma.hbm_to_vmem [thread:$0]  %s4135_s1, 16384, %s38_s22, [#allocation6], %s3658_s13, %s3658_s13, %s3659_s14  }
  0x15   :  { %s3660_s17 = smov [#allocation8]   ;;  %s3493_s21 = scalar_lea.hbm %s4137_s3, 768 }
  0x16   :  { %s59_s18 = sshll.u32 %s3660_s17, 4  ;;  %p3494_p8 = scmp.ne.s32.totalorder %s4137_s3, %s3493_s21  ;;  %s60_s18 = int_to_ptr.vmem [resolvable:$true] %s59_s18 }
  0x17   :  { %p3497_p9 = scmp.lt.u32.totalorder %s3493_s21, %s4137_s3 }
  0x19   :  { %p3499_p10 = pnand %p3497_p9, %p3494_p8 }
  0x1b   :  { %3502 = shalt.err (!%p3499_p10)
}
  0x1c   :  { %s3503_s27 = scalar_lea.vmem %s60_s18, 768  ;;  %p3508_p12 = scmp.lt.s32.totalorder %s60_s18, %s60_s18 }
  0x1d   :  { %p3504_p11 = scmp.ne.s32.totalorder %s60_s18, %s3503_s27  ;;  %p3509_p13 = scmp.lt.s32.totalorder %s3503_s27, %s3503_s27 }
  0x1f   :  { %p3510_p0 = por %p3509_p13, %p3508_p12 }
  0x21   :  { %p3511_p1 = pnand %p3510_p0, %p3504_p11 }
  0x23   :  { %3514 = shalt.err (!%p3511_p1)
}
  0x24   :  { %s3661_s1 = smov 128   ;;  %s3662_s22 = smov 8  }
  0x25   :  { %65 = dma.hbm_to_vmem [thread:$0]  %s4137_s3, 768, %s60_s18, [#allocation9], %s3661_s1, %s3661_s1, %s3662_s22  }
  0x26   :  { %s3663_s30 = smov [#allocation11]   ;;  %s3664_s14 = smov [#allocation2]  }
  0x27   :  { %s87_s13 = sshll.u32 %s3663_s30, 4  ;;  %s28_s15 = sshll.u32 %s3664_s14, 4  ;;  %s88_s13 = int_to_ptr.vmem [resolvable:$true] %s87_s13  ;;  %s29_s15 = int_to_ptr.vmem [resolvable:$true] %s28_s15 }
  0x28   :  { %s3515_s19 = scalar_lea.hbm %s4141_s7, 768 }
  0x29   :  { %p3516_p2 = scmp.ne.s32.totalorder %s4141_s7, %s3515_s19  ;;  %p3519_p3 = scmp.lt.u32.totalorder %s3515_s19, %s4141_s7 }
  0x2b   :  { %p3521_p4 = pnand %p3519_p3, %p3516_p2 }
  0x2d   :  { %3524 = shalt.err (!%p3521_p4)
}
  0x2e   :  { %s3525_s3 = scalar_lea.vmem %s88_s13, 768  ;;  %p3530_p6 = scmp.lt.s32.totalorder %s88_s13, %s88_s13 }
  0x2f   :  { %p3526_p5 = scmp.ne.s32.totalorder %s88_s13, %s3525_s3  ;;  %p3531_p7 = scmp.lt.s32.totalorder %s3525_s3, %s3525_s3 }
  0x31   :  { %p3532_p8 = por %p3531_p7, %p3530_p6 }
  0x33   :  { %p3533_p9 = pnand %p3532_p8, %p3526_p5 }
  0x35   :  { %3536 = shalt.err (!%p3533_p9)
}
  0x36   :  { %93 = dma.hbm_to_vmem [thread:$0]  %s4141_s7, 768, %s88_s13, [#allocation12], %s3661_s1, %s3661_s1, %s3662_s22  }
  0x37   :  { %s3537_s28 = scalar_lea.hbm %s4134_s0, 128 }
  0x38   :  { %p3538_p10 = scmp.ne.s32.totalorder %s4134_s0, %s3537_s28  ;;  %p3541_p11 = scmp.lt.u32.totalorder %s3537_s28, %s4134_s0 }
  0x3a   :  { %p3543_p12 = pnand %p3541_p11, %p3538_p10 }
  0x3c   :  { %3546 = shalt.err (!%p3543_p12)
}
  0x3d   :  { %s3547_s17 = scalar_lea.vmem %s29_s15, 128  ;;  %p3552_p0 = scmp.lt.s32.totalorder %s29_s15, %s29_s15 }
  0x3e   :  { %p3548_p13 = scmp.ne.s32.totalorder %s29_s15, %s3547_s17  ;;  %p3553_p1 = scmp.lt.s32.totalorder %s3547_s17, %s3547_s17 }
  0x40   :  { %p3554_p2 = por %p3553_p1, %p3552_p0 }
  0x42   :  { %p3555_p3 = pnand %p3554_p2, %p3548_p13 }
  0x44   :  { %3558 = shalt.err (!%p3555_p3)
}
  0x45   :  { %31 = dma.hbm_to_vmem [thread:$0]  %s4134_s0, 128, %s29_s15, [#allocation3]  }
  0x46   :  { %s3665_s19 = smov [#allocation7]   ;;  %s3666_s21 = smov [#allocation10]  }
  0x47   :  { %s50_s20 = sshll.u32 %s3665_s19, 4  ;;  %s73_s23 = sshll.u32 %s3666_s21, 4  ;;  %s51_s20 = int_to_ptr.vmem [resolvable:$true] %s50_s20  ;;  %s3795_s23 = int_to_ptr.vmem [resolvable:$true] %s73_s23 }
  0x48   :  { %s3559_s18 = scalar_lea.hbm %s4136_s2, 128 }
  0x49   :  { %p3560_p4 = scmp.ne.s32.totalorder %s4136_s2, %s3559_s18  ;;  %p3563_p5 = scmp.lt.u32.totalorder %s3559_s18, %s4136_s2 }
  0x4b   :  { %p3565_p6 = pnand %p3563_p5, %p3560_p4 }
  0x4d   :  { %3568 = shalt.err (!%p3565_p6)
}
  0x4e   :  { %s3569_s0 = scalar_lea.vmem %s51_s20, 128  ;;  %p3574_p8 = scmp.lt.s32.totalorder %s51_s20, %s51_s20 }
  0x4f   :  { %p3570_p7 = scmp.ne.s32.totalorder %s51_s20, %s3569_s0  ;;  %p3575_p9 = scmp.lt.s32.totalorder %s3569_s0, %s3569_s0 }
  0x51   :  { %p3576_p10 = por %p3575_p9, %p3574_p8 }
  0x53   :  { %p3577_p11 = pnand %p3576_p10, %p3570_p7 }
  0x55   :  { %3580 = shalt.err (!%p3577_p11)
}
  0x56   :  { %53 = dma.hbm_to_vmem [thread:$0]  %s4136_s2, 128, %s51_s20, [#allocation6]  }
  0x57   :  { %s3581_s16 = scalar_lea.hbm %s4139_s5, 256 }
  0x58   :  { %p3582_p12 = scmp.ne.s32.totalorder %s4139_s5, %s3581_s16  ;;  %p3585_p13 = scmp.lt.u32.totalorder %s3581_s16, %s4139_s5 }
  0x5a   :  { %p3587_p0 = pnand %p3585_p13, %p3582_p12 }
  0x5c   :  { %3590 = shalt.err (!%p3587_p0)
}
  0x5d   :  { %s3591_s21 = scalar_lea.vmem %s3795_s23, 256  ;;  %p3596_p2 = scmp.lt.s32.totalorder %s3795_s23, %s3795_s23 }
  0x5e   :  { %p3592_p1 = scmp.ne.s32.totalorder %s3795_s23, %s3591_s21  ;;  %p3597_p3 = scmp.lt.s32.totalorder %s3591_s21, %s3591_s21 }
  0x60   :  { %p3598_p4 = por %p3597_p3, %p3596_p2 }
  0x62   :  { %p3599_p5 = pnand %p3598_p4, %p3592_p1 }
  0x64   :  { %3602 = shalt.err (!%p3599_p5)
}
  0x65   :  { %79 = dma.hbm_to_vmem [thread:$0]  %s4139_s5, 256, %s3795_s23, [#allocation9], %s3661_s1, %s3661_s1, %s3662_s22  }
  0x66   :  { %s3667_s24 = smov [#allocation13]   ;;  %s3603_s26 = scalar_lea.hbm %s4143_s9, 384 }
  0x67   :  { %s101_s3 = sshll.u32 %s3667_s24, 4  ;;  %p3604_p6 = scmp.ne.s32.totalorder %s4143_s9, %s3603_s26  ;;  %s102_s3 = int_to_ptr.vmem [resolvable:$true] %s101_s3 }
  0x68   :  { %p3607_p7 = scmp.lt.u32.totalorder %s3603_s26, %s4143_s9 }
  0x6a   :  { %p3609_p8 = pnand %p3607_p7, %p3604_p6 }
  0x6c   :  { %3612 = shalt.err (!%p3609_p8)
}
  0x6d   :  { %s3613_s29 = scalar_lea.vmem %s102_s3, 384  ;;  %p3618_p10 = scmp.lt.s32.totalorder %s102_s3, %s102_s3 }
  0x6e   :  { %p3614_p9 = scmp.ne.s32.totalorder %s102_s3, %s3613_s29  ;;  %p3619_p11 = scmp.lt.s32.totalorder %s3613_s29, %s3613_s29 }
  0x70   :  { %p3620_p12 = por %p3619_p11, %p3618_p10 }
  0x72   :  { %p3621_p13 = pnand %p3620_p12, %p3614_p9 }
  0x74   :  { %3624 = shalt.err (!%p3621_p13)
}
  0x75   :  { %107 = dma.hbm_to_vmem [thread:$0]  %s4143_s9, 384, %s102_s3, [#allocation12], %s3661_s1, %s3661_s1, %s3662_s22  }
  0x76   :  { %3647 = dma.done.wait [#allocation3], 128  }
  0x77   :  { %3648 = vsyncadd [#allocation3], 4294967168 }
  0x78   :  { %3649 = dma.done.wait [#allocation6], 16512  }
  0x79   :  { %3650 = vsyncadd [#allocation6], 4294950784 }
  0x7a   :  { %3651 = dma.done.wait [#allocation9], 1024  }
  0x7b   :  { %3652 = vsyncadd [#allocation9], 4294966272 }
  0x7c   :  { %3653 = dma.done.wait [#allocation12], 1152  }
  0x7d   :  { %3654 = vsyncadd [#allocation12], 4294966144  ;;  %v3668_v0 = vmov 0.0   ;;  %v135_v1 = vld [vmem:[#allocation5 + $0x8] sm:$0xff]  ;;  %v134_v3 = vld [vmem:[#allocation5] sm:$0xff]  ;;  %vm602_vm0 = vcmask 523264  }
  0x7e   :  { %368 = vmatprep.mubr.f32.mxu0 %v3668_v0  ;;  %439 = vmatprep.mubr.f32.mxu1 %v3668_v0  ;;  %v143_v2 = vld [vmem:[#allocation5 + $0x48] sm:$0xff]  ;;  %v142_v5 = vld [vmem:[#allocation5 + $0x40] sm:$0xff]  ;;  %v137_v6 = vld [vmem:[#allocation5 + $0x18] sm:$0xff]  ;;  %vm3670_vm1 = vmmov 0   ;;  %vm804_vm2 = vcmask 391168   ;;  %vm802_vm3 = vcmask 392192  }
  0x7f   :  { %v3122_v4 = vpack.c.bf16 %v143_v2, %v135_v1  ;;  %v145_v7 = vld [vmem:[#allocation5 + $0x58] sm:$0xff]  ;;  %v3124_v8 = vpack.c.bf16 %v142_v5, %v134_v3  ;;  %v151_v10 = vld [vmem:[#allocation5 + $0x88] sm:$0xff]  ;;  %v136_v12 = vld [vmem:[#allocation5 + $0x10] sm:$0xff]  ;;  %s3671_s3 = smov 80   ;;  %s3673_s18 = smov 48   ;;  %vm1095_vm4 = vcmask 195584  }
  0x80   :  { %v3154_v9 = vpack.c.bf16 %v145_v7, %v137_v6  ;;  %v159_v11 = vld [vmem:[#allocation5 + $0xc8] sm:$0xff]  ;;  %v144_v14 = vld [vmem:[#allocation5 + $0x50] sm:$0xff]  ;;  %v150_v15 = vld [vmem:[#allocation5 + $0x80] sm:$0xff]  ;;  %s3674_s25 = smov 56   ;;  %s3675_s9 = smov [#allocation14]   ;;  %vm2738_vm5 = vcmask 8192  }
  0x81   :  { %3123 = vmatprep.subr.bf16.mxu0 %v3122_v4  ;;  %v3126_v13 = vpack.c.bf16 %v159_v11, %v151_v10  ;;  %v158_v16 = vld [vmem:[#allocation5 + $0xc0] sm:$0xff]  ;;  %v3156_v17 = vpack.c.bf16 %v144_v14, %v136_v12  ;;  %v153_v19 = vld [vmem:[#allocation5 + $0x98] sm:$0xff]  ;;  %v167_v21 = vld [vmem:[#allocation5 + $0x108] sm:$0xff]  ;;  %s2746_s1 = sshll.u32 %s3675_s9, 4  ;;  %s2747_s1 = int_to_ptr.vmem [resolvable:$true] %s2746_s1 }
  0x82   :  { %3125 = vmatpush1.bf16.msra.mxu0 %v3124_v8  ;;  %3155 = vmatprep.subr.bf16.mxu1 %v3154_v9  ;;  %v3128_v18 = vpack.c.bf16 %v158_v16, %v150_v15  ;;  %v161_v20 = vld [vmem:[#allocation5 + $0xd8] sm:$0xff]  ;;  %v175_v23 = vld [vmem:[#allocation5 + $0x148] sm:$0xff]  ;;  %v152_v24 = vld [vmem:[#allocation5 + $0x90] sm:$0xff]  ;;  %s3629_s22 = scalar_lea.vmem %s2747_s1, 32  ;;  %p3630_p1 = scmp.lt.s32.totalorder %s2747_s1, %s2747_s1 }
  0x83   :  { %3127 = vmatprep.subr.bf16.mxu0 %v3126_v13  ;;  %v3158_v22 = vpack.c.bf16 %v161_v20, %v153_v19  ;;  %v160_v25 = vld [vmem:[#allocation5 + $0xd0] sm:$0xff]  ;;  %3157 = vmatpush1.bf16.msra.mxu1 %v3156_v17  ;;  %v3130_v26 = vpack.c.bf16 %v175_v23, %v167_v21  ;;  %v166_v28 = vld [vmem:[#allocation5 + $0x100] sm:$0xff]  ;;  %v169_v30 = vld [vmem:[#allocation5 + $0x118] sm:$0xff] }
  0x84   :  { %v3160_v27 = vpack.c.bf16 %v160_v25, %v152_v24  ;;  %v174_v29 = vld [vmem:[#allocation5 + $0x140] sm:$0xff]  ;;  %v177_v31 = vld [vmem:[#allocation5 + $0x158] sm:$0xff]  ;;  %v183_v32 = vld [vmem:[#allocation5 + $0x188] sm:$0xff] }
  0x85   :  { %3159 = vmatprep.subr.bf16.mxu1 %v3158_v22  ;;  %v191_v33 = vld [vmem:[#allocation5 + $0x1c8] sm:$0xff]  ;;  %v3132_v34 = vpack.c.bf16 %v174_v29, %v166_v28  ;;  %v3162_v35 = vpack.c.bf16 %v177_v31, %v169_v30  ;;  %v168_v36 = vld [vmem:[#allocation5 + $0x110] sm:$0xff]  ;;  %v182_v38 = vld [vmem:[#allocation5 + $0x180] sm:$0xff] }
  0x86   :  { %3129 = vmatpush1.bf16.msra.mxu0 %v3128_v18  ;;  %v176_v37 = vld [vmem:[#allocation5 + $0x150] sm:$0xff]  ;;  %v3134_v39 = vpack.c.bf16 %v191_v33, %v183_v32  ;;  %v190_v40 = vld [vmem:[#allocation5 + $0x1c0] sm:$0xff]  ;;  %v185_v41 = vld [vmem:[#allocation5 + $0x198] sm:$0xff] }
  0x87   :  { %3131 = vmatprep.subr.bf16.mxu0 %v3130_v26  ;;  %v193_v42 = vld [vmem:[#allocation5 + $0x1d8] sm:$0xff]  ;;  %3161 = vmatpush1.bf16.msra.mxu1 %v3160_v27  ;;  %v3164_v43 = vpack.c.bf16 %v176_v37, %v168_v36  ;;  %v199_v44 = vld [vmem:[#allocation5 + $0x208] sm:$0xff]  ;;  %v184_v47 = vld [vmem:[#allocation5 + $0x190] sm:$0xff]  ;;  %v3136_v49 = vpack.c.bf16 %v190_v40, %v182_v38 }
  0x88   :  { %v207_v45 = vld [vmem:[#allocation5 + $0x248] sm:$0xff]  ;;  %3163 = vmatprep.subr.bf16.mxu1 %v3162_v35  ;;  %v3166_v46 = vpack.c.bf16 %v193_v42, %v185_v41  ;;  %v192_v48 = vld [vmem:[#allocation5 + $0x1d0] sm:$0xff]  ;;  %v201_v50 = vld [vmem:[#allocation5 + $0x218] sm:$0xff] }
  0x89   :  { %v209_v51 = vld [vmem:[#allocation5 + $0x258] sm:$0xff]  ;;  %v3138_v52 = vpack.c.bf16 %v207_v45, %v199_v44  ;;  %v198_v53 = vld [vmem:[#allocation5 + $0x200] sm:$0xff]  ;;  %v3168_v55 = vpack.c.bf16 %v192_v48, %v184_v47  ;;  %v215_v56 = vld [vmem:[#allocation5 + $0x288] sm:$0xff] }
  0x8a   :  { %3133 = vmatpush1.bf16.msra.mxu0 %v3132_v34  ;;  %v206_v54 = vld [vmem:[#allocation5 + $0x240] sm:$0xff]  ;;  %v223_v57 = vld [vmem:[#allocation5 + $0x2c8] sm:$0xff]  ;;  %v3170_v58 = vpack.c.bf16 %v209_v51, %v201_v50  ;;  %v200_v59 = vld [vmem:[#allocation5 + $0x210] sm:$0xff] }
  0x8b   :  { %3135 = vmatprep.subr.bf16.mxu0 %v3134_v39  ;;  %3165 = vmatpush1.bf16.msra.mxu1 %v3164_v43  ;;  %v208_v60 = vld [vmem:[#allocation5 + $0x250] sm:$0xff]  ;;  %v3140_v61 = vpack.c.bf16 %v206_v54, %v198_v53  ;;  %v217_v62 = vld [vmem:[#allocation5 + $0x298] sm:$0xff]  ;;  %v3142_v1 = vpack.c.bf16 %v223_v57, %v215_v56  ;;  %v214_v2 = vld [vmem:[#allocation5 + $0x280] sm:$0xff] }
  0x8c   :  { %3167 = vmatprep.subr.bf16.mxu1 %v3166_v46  ;;  %v225_v63 = vld [vmem:[#allocation5 + $0x2d8] sm:$0xff]  ;;  %v222_v3 = vld [vmem:[#allocation5 + $0x2c0] sm:$0xff]  ;;  %v3172_v4 = vpack.c.bf16 %v208_v60, %v200_v59  ;;  %v231_v5 = vld [vmem:[#allocation5 + $0x308] sm:$0xff] }
  0x8d   :  { %v239_v6 = vld [vmem:[#allocation5 + $0x348] sm:$0xff]  ;;  %v3174_v7 = vpack.c.bf16 %v225_v63, %v217_v62  ;;  %v216_v8 = vld [vmem:[#allocation5 + $0x290] sm:$0xff]  ;;  %v3144_v10 = vpack.c.bf16 %v222_v3, %v214_v2  ;;  %v233_v11 = vld [vmem:[#allocation5 + $0x318] sm:$0xff] }
  0x8e   :  { %3137 = vmatpush1.bf16.msra.mxu0 %v3136_v49  ;;  %v224_v9 = vld [vmem:[#allocation5 + $0x2d0] sm:$0xff]  ;;  %v241_v12 = vld [vmem:[#allocation5 + $0x358] sm:$0xff]  ;;  %v3146_v13 = vpack.c.bf16 %v239_v6, %v231_v5  ;;  %v230_v14 = vld [vmem:[#allocation5 + $0x300] sm:$0xff] }
  0x8f   :  { %3139 = vmatprep.subr.bf16.mxu0 %v3138_v52  ;;  %3169 = vmatpush1.bf16.msra.mxu1 %v3168_v55  ;;  %v238_v15 = vld [vmem:[#allocation5 + $0x340] sm:$0xff]  ;;  %v3176_v16 = vpack.c.bf16 %v224_v9, %v216_v8  ;;  %v247_v17 = vld [vmem:[#allocation5 + $0x388] sm:$0xff]  ;;  %v3178_v19 = vpack.c.bf16 %v241_v12, %v233_v11  ;;  %v232_v20 = vld [vmem:[#allocation5 + $0x310] sm:$0xff] }
  0x90   :  { %3171 = vmatprep.subr.bf16.mxu1 %v3170_v58  ;;  %v255_v18 = vld [vmem:[#allocation5 + $0x3c8] sm:$0xff]  ;;  %v240_v21 = vld [vmem:[#allocation5 + $0x350] sm:$0xff]  ;;  %v3148_v22 = vpack.c.bf16 %v238_v15, %v230_v14  ;;  %v249_v23 = vld [vmem:[#allocation5 + $0x398] sm:$0xff] }
  0x91   :  { %v257_v24 = vld [vmem:[#allocation5 + $0x3d8] sm:$0xff]  ;;  %v3150_v25 = vpack.c.bf16 %v255_v18, %v247_v17  ;;  %v246_v26 = vld [vmem:[#allocation5 + $0x380] sm:$0xff]  ;;  %v3180_v28 = vpack.c.bf16 %v240_v21, %v232_v20  ;;  %v139_v29 = vld [vmem:[#allocation5 + $0x28] sm:$0xff] }
  0x92   :  { %3141 = vmatpush1.bf16.msra.mxu0 %v3140_v61  ;;  %v254_v27 = vld [vmem:[#allocation5 + $0x3c0] sm:$0xff]  ;;  %v147_v30 = vld [vmem:[#allocation5 + $0x68] sm:$0xff]  ;;  %v3182_v31 = vpack.c.bf16 %v257_v24, %v249_v23  ;;  %v248_v32 = vld [vmem:[#allocation5 + $0x390] sm:$0xff] }
  0x93   :  { %3143 = vmatprep.subr.bf16.mxu0 %v3142_v1  ;;  %3173 = vmatpush1.bf16.msra.mxu1 %v3172_v4  ;;  %v256_v33 = vld [vmem:[#allocation5 + $0x3d0] sm:$0xff]  ;;  %v3152_v34 = vpack.c.bf16 %v254_v27, %v246_v26  ;;  %v141_v35 = vld [vmem:[#allocation5 + $0x38] sm:$0xff]  ;;  %v3186_v37 = vpack.c.bf16 %v147_v30, %v139_v29  ;;  %v138_v38 = vld [vmem:[#allocation5 + $0x20] sm:$0xff] }
  0x94   :  { %3175 = vmatprep.subr.bf16.mxu1 %v3174_v7  ;;  %v149_v36 = vld [vmem:[#allocation5 + $0x78] sm:$0xff]  ;;  %v146_v39 = vld [vmem:[#allocation5 + $0x60] sm:$0xff]  ;;  %v3184_v40 = vpack.c.bf16 %v256_v33, %v248_v32  ;;  %v155_v41 = vld [vmem:[#allocation5 + $0xa8] sm:$0xff] }
  0x95   :  { %v163_v42 = vld [vmem:[#allocation5 + $0xe8] sm:$0xff]  ;;  %v3218_v43 = vpack.c.bf16 %v149_v36, %v141_v35  ;;  %v140_v44 = vld [vmem:[#allocation5 + $0x30] sm:$0xff]  ;;  %v3846_v46 = vld [vmem:[#allocation2] sm:$0xff]  ;;  %v3188_v47 = vpack.c.bf16 %v146_v39, %v138_v38 }
  0x96   :  { %3145 = vmatpush1.bf16.msra.mxu0 %v3144_v10  ;;  %v148_v45 = vld [vmem:[#allocation5 + $0x70] sm:$0xff]  ;;  %v157_v48 = vld [vmem:[#allocation5 + $0xb8] sm:$0xff]  ;;  %v3190_v50 = vpack.c.bf16 %v163_v42, %v155_v41  ;;  %v154_v51 = vld [vmem:[#allocation5 + $0xa0] sm:$0xff] }
  0x97   :  { %3147 = vmatprep.subr.bf16.mxu0 %v3146_v13  ;;  %3177 = vmatpush1.bf16.msra.mxu1 %v3176_v16  ;;  %v165_v49 = vld [vmem:[#allocation5 + $0xf8] sm:$0xff]  ;;  %v162_v52 = vld [vmem:[#allocation5 + $0xe0] sm:$0xff]  ;;  %v3220_v53 = vpack.c.bf16 %v148_v45, %v140_v44  ;;  %v171_v54 = vld [vmem:[#allocation5 + $0x128] sm:$0xff] }
  0x98   :  { %3179 = vmatprep.subr.bf16.mxu1 %v3178_v19  ;;  %v179_v55 = vld [vmem:[#allocation5 + $0x168] sm:$0xff]  ;;  %v3222_v56 = vpack.c.bf16 %v165_v49, %v157_v48  ;;  %v156_v57 = vld [vmem:[#allocation5 + $0xb0] sm:$0xff]  ;;  %v3192_v59 = vpack.c.bf16 %v162_v52, %v154_v51  ;;  %v173_v60 = vld [vmem:[#allocation5 + $0x138] sm:$0xff] }
  0x99   :  { %v164_v58 = vld [vmem:[#allocation5 + $0xf0] sm:$0xff]  ;;  %v181_v61 = vld [vmem:[#allocation5 + $0x178] sm:$0xff]  ;;  %v3194_v62 = vpack.c.bf16 %v179_v55, %v171_v54  ;;  %v170_v63 = vld [vmem:[#allocation5 + $0x120] sm:$0xff] }
  0x9a   :  { %3149 = vmatpush1.bf16.msra.mxu0 %v3148_v22  ;;  %v178_v1 = vld [vmem:[#allocation5 + $0x160] sm:$0xff]  ;;  %v3224_v2 = vpack.c.bf16 %v164_v58, %v156_v57  ;;  %v187_v3 = vld [vmem:[#allocation5 + $0x1a8] sm:$0xff]  ;;  %v3226_v5 = vpack.c.bf16 %v181_v61, %v173_v60  ;;  %v172_v6 = vld [vmem:[#allocation5 + $0x130] sm:$0xff] }
  0x9b   :  { %3151 = vmatprep.subr.bf16.mxu0 %v3150_v25  ;;  %3181 = vmatpush1.bf16.msra.mxu1 %v3180_v28  ;;  %v195_v4 = vld [vmem:[#allocation5 + $0x1e8] sm:$0xff]  ;;  %v180_v7 = vld [vmem:[#allocation5 + $0x170] sm:$0xff]  ;;  %v3196_v8 = vpack.c.bf16 %v178_v1, %v170_v63  ;;  %v189_v9 = vld [vmem:[#allocation5 + $0x1b8] sm:$0xff] }
  0x9c   :  { %3183 = vmatprep.subr.bf16.mxu1 %v3182_v31  ;;  %v197_v10 = vld [vmem:[#allocation5 + $0x1f8] sm:$0xff]  ;;  %v3198_v11 = vpack.c.bf16 %v195_v4, %v187_v3  ;;  %v186_v12 = vld [vmem:[#allocation5 + $0x1a0] sm:$0xff]  ;;  %v3228_v14 = vpack.c.bf16 %v180_v7, %v172_v6  ;;  %v203_v15 = vld [vmem:[#allocation5 + $0x228] sm:$0xff]  ;;  %v264_v7 = vlaneseq }
  0x9d   :  { %v194_v13 = vld [vmem:[#allocation5 + $0x1e0] sm:$0xff]  ;;  %v211_v16 = vld [vmem:[#allocation5 + $0x268] sm:$0xff]  ;;  %v3230_v17 = vpack.c.bf16 %v197_v10, %v189_v9  ;;  %v188_v18 = vld [vmem:[#allocation5 + $0x1b0] sm:$0xff] }
  0x9e   :  { %3153 = vmatpush1.bf16.msra.mxu0 %v3152_v34  ;;  %v196_v19 = vld [vmem:[#allocation5 + $0x1f0] sm:$0xff]  ;;  %v3200_v20 = vpack.c.bf16 %v194_v13, %v186_v12  ;;  %v205_v21 = vld [vmem:[#allocation5 + $0x238] sm:$0xff]  ;;  %v3202_v23 = vpack.c.bf16 %v211_v16, %v203_v15  ;;  %v202_v24 = vld [vmem:[#allocation5 + $0x220] sm:$0xff] }
  0x9f   :  { %3187 = vmatprep.subr.bf16.mxu0 %v3186_v37  ;;  %3185 = vmatpush1.bf16.msra.mxu1 %v3184_v40  ;;  %v213_v22 = vld [vmem:[#allocation5 + $0x278] sm:$0xff]  ;;  %v210_v25 = vld [vmem:[#allocation5 + $0x260] sm:$0xff]  ;;  %v3232_v26 = vpack.c.bf16 %v196_v19, %v188_v18  ;;  %v219_v27 = vld [vmem:[#allocation5 + $0x2a8] sm:$0xff] }
  0xa0   :  { %3219 = vmatprep.subr.bf16.mxu1 %v3218_v43  ;;  %v227_v28 = vld [vmem:[#allocation5 + $0x2e8] sm:$0xff]  ;;  %v3234_v29 = vpack.c.bf16 %v213_v22, %v205_v21  ;;  %v204_v30 = vld [vmem:[#allocation5 + $0x230] sm:$0xff]  ;;  %v3204_v32 = vpack.c.bf16 %v210_v25, %v202_v24  ;;  %v221_v33 = vld [vmem:[#allocation5 + $0x2b8] sm:$0xff] }
  0xa1   :  { %369 = vmatmul.mubr.f32.vlgmr.msra.gmra.mrb[0].mxu0 %v3846_v46  ;;  %v212_v31 = vld [vmem:[#allocation5 + $0x270] sm:$0xff]  ;;  %v229_v34 = vld [vmem:[#allocation5 + $0x2f8] sm:$0xff]  ;;  %v3206_v35 = vpack.c.bf16 %v227_v28, %v219_v27  ;;  %v218_v36 = vld [vmem:[#allocation5 + $0x2a0] sm:$0xff] }
  0xa2   :  { %3189 = vmatpush1.bf16.msra.mxu0 %v3188_v47  ;;  %510 = vmatprep.mubr.f32.mxu0 %v3668_v0  ;;  %v226_v37 = vld [vmem:[#allocation5 + $0x2e0] sm:$0xff]  ;;  %v3236_v38 = vpack.c.bf16 %v212_v31, %v204_v30  ;;  %v235_v39 = vld [vmem:[#allocation5 + $0x328] sm:$0xff]  ;;  %v3238_v41 = vpack.c.bf16 %v229_v34, %v221_v33  ;;  %v220_v42 = vld [vmem:[#allocation5 + $0x2b0] sm:$0xff] }
  0xa3   :  { %440 = vmatmul.mubr.f32.vlgmr.msra.gmra.mrb[0].mxu1 %v3846_v46  ;;  %3191 = vmatprep.subr.bf16.mxu0 %v3190_v50  ;;  %v243_v40 = vld [vmem:[#allocation5 + $0x368] sm:$0xff]  ;;  %v228_v43 = vld [vmem:[#allocation5 + $0x2f0] sm:$0xff]  ;;  %v3208_v44 = vpack.c.bf16 %v226_v37, %v218_v36  ;;  %v237_v45 = vld [vmem:[#allocation5 + $0x338] sm:$0xff] }
  0xa4   :  { %3221 = vmatpush1.bf16.msra.mxu1 %v3220_v53  ;;  %581 = vmatprep.mubr.f32.mxu1 %v3668_v0  ;;  %v245_v47 = vld [vmem:[#allocation5 + $0x378] sm:$0xff]  ;;  %v3210_v48 = vpack.c.bf16 %v243_v40, %v235_v39  ;;  %v234_v49 = vld [vmem:[#allocation5 + $0x320] sm:$0xff]  ;;  %v3240_v51 = vpack.c.bf16 %v228_v43, %v220_v42  ;;  %v251_v52 = vld [vmem:[#allocation5 + $0x3a8] sm:$0xff] }
  0xa5   :  { %3223 = vmatprep.subr.bf16.mxu1 %v3222_v56  ;;  %v242_v50 = vld [vmem:[#allocation5 + $0x360] sm:$0xff]  ;;  %v259_v53 = vld [vmem:[#allocation5 + $0x3e8] sm:$0xff]  ;;  %v3242_v54 = vpack.c.bf16 %v245_v47, %v237_v45  ;;  %v236_v55 = vld [vmem:[#allocation5 + $0x330] sm:$0xff] }
  0xa6   :  { %3193 = vmatpush1.bf16.msra.mxu0 %v3192_v59  ;;  %v244_v56 = vld [vmem:[#allocation5 + $0x370] sm:$0xff]  ;;  %v3212_v57 = vpack.c.bf16 %v242_v50, %v234_v49  ;;  %v253_v58 = vld [vmem:[#allocation5 + $0x3b8] sm:$0xff]  ;;  %v3214_v60 = vpack.c.bf16 %v259_v53, %v251_v52  ;;  %v250_v61 = vld [vmem:[#allocation5 + $0x3a0] sm:$0xff] }
  0xa7   :  { %3195 = vmatprep.subr.bf16.mxu0 %v3194_v62  ;;  %v261_v59 = vld [vmem:[#allocation5 + $0x3f8] sm:$0xff]  ;;  %v258_v62 = vld [vmem:[#allocation5 + $0x3e0] sm:$0xff]  ;;  %v3244_v63 = vpack.c.bf16 %v244_v56, %v236_v55  ;;  %v260_v3 = vld [vmem:[#allocation5 + $0x3f0] sm:$0xff] }
  0xa8   :  { %3225 = vmatpush1.bf16.msra.mxu1 %v3224_v2  ;;  %v3246_v1 = vpack.c.bf16 %v261_v59, %v253_v58  ;;  %v252_v2 = vld [vmem:[#allocation5 + $0x3b0] sm:$0xff]  ;;  %v3216_v4 = vpack.c.bf16 %v258_v62, %v250_v61  ;;  %v596_v6 = vld [vmem:[#allocation8] sm:$0xff]  ;;  %v262_v10 = vld [vmem:[#allocation7] sm:$0xff] }
  0xa9   :  { %3227 = vmatprep.subr.bf16.mxu1 %v3226_v5  ;;  %v3248_v5 = vpack.c.bf16 %v260_v3, %v252_v2  ;;  %v598_v55 = vld [vmem:[#allocation8 + $0x10] sm:$0xff]  ;;  %v599_v56 = vld [vmem:[#allocation8 + $0x18] sm:$0xff]  ;;  %v601_v58 = vld [vmem:[#allocation8 + $0x28] sm:$0xff] }
  0xaa   :  { %3197 = vmatpush1.bf16.msra.mxu0 %v3196_v8  ;;  %v265_v8 = vshrl.u32 %v264_v7, 7  ;;  %v716_v59 = vld [vmem:[#allocation10] sm:$0xff] }
  0xab   :  { %3199 = vmatprep.subr.bf16.mxu0 %v3198_v11  ;;  %v824_v7 = vld [vmem:[%s4140_s6] sm:$0xff] }
  0xac   :  { %3229 = vmatpush1.bf16.msra.mxu1 %v3228_v14  ;;  %v3855_v9 = vsub.s32 0, %v265_v8  ;;  %v270_v11 = vsub.s32 1, %v265_v8  ;;  %v274_v12 = vsub.s32 2, %v265_v8  ;;  %v278_v13 = vsub.s32 3, %v265_v8 }
  0xad   :  { %3231 = vmatprep.subr.bf16.mxu1 %v3230_v17  ;;  %v282_v31 = vsub.s32 4, %v265_v8  ;;  %v290_v33 = vsub.s32 6, %v265_v8  ;;  %v294_v34 = vsub.s32 7, %v265_v8 }
  0xae   :  { %3201 = vmatpush1.bf16.msra.mxu0 %v3200_v20  ;;  %v267_v14 = vrot.slane %v262_v10, %v3855_v9  ;;  %v271_v15 = vrot.slane %v262_v10, %v270_v11  ;;  %v275_v16 = vrot.slane %v262_v10, %v274_v12  ;;  %v279_v18 = vrot.slane %v262_v10, %v278_v13  ;;  %v826_v12 = vld [vmem:[%s4140_s6 + $0x10] sm:$0xff]  ;;  %v827_v13 = vld [vmem:[%s4140_s6 + $0x18] sm:$0xff] }
  0xaf   :  { %3203 = vmatprep.subr.bf16.mxu0 %v3202_v23  ;;  %v291_v37 = vrot.slane %v262_v10, %v290_v33  ;;  %v295_v39 = vrot.slane %v262_v10, %v294_v34  ;;  %v3669_v11 = vmov 0.0|0.0  }
  0xb0   :  { %3233 = vmatpush1.bf16.msra.mxu1 %v3232_v26 }
  0xb1   :  { %3235 = vmatprep.subr.bf16.mxu1 %v3234_v29 }
  0xb2   :  { %3205 = vmatpush1.bf16.msra.mxu0 %v3204_v32  ;;  %v286_v32 = vsub.s32 5, %v265_v8  ;;  %v825_v8 = vld [vmem:[%s4140_s6 + $0x8] sm:$0xff] }
  0xb3   :  { %3207 = vmatprep.subr.bf16.mxu0 %v3206_v35  ;;  %v283_v35 = vrot.slane %v262_v10, %v282_v31 }
  0xb4   :  { %3237 = vmatpush1.bf16.msra.mxu1 %v3236_v38  ;;  %v287_v36 = vrot.slane %v262_v10, %v286_v32  ;;  %v3279_v10 = vpack.c.bf16 %v825_v8, %v824_v7 }
  0xb5   :  { %3239 = vmatprep.subr.bf16.mxu1 %v3238_v41 }
  0xb6   :  { %3209 = vmatpush1.bf16.msra.mxu0 %v3208_v44 }
  0xb7   :  { %3211 = vmatprep.subr.bf16.mxu0 %v3210_v48 }
  0xb8   :  { %3241 = vmatpush1.bf16.msra.mxu1 %v3240_v51 }
  0xb9   :  { %3243 = vmatprep.subr.bf16.mxu1 %v3242_v54  ;;  %v597_v54 = vld [vmem:[#allocation8 + $0x8] sm:$0xff] }
  0xba   :  { %3213 = vmatpush1.bf16.msra.mxu0 %v3212_v57  ;;  %v600_v57 = vld [vmem:[#allocation8 + $0x20] sm:$0xff] }
  0xbb   :  { %3215 = vmatprep.subr.bf16.mxu0 %v3214_v60 }
  0xbc   :  { %3245 = vmatpush1.bf16.msra.mxu1 %v3244_v63 }
  0xbd   :  { %3247 = vmatprep.subr.bf16.mxu1 %v3246_v1 }
  0xbe   :  { %3217 = vmatpush1.bf16.msra.mxu0 %v3216_v4 }
  0xc0   :  { %3249 = vmatpush1.bf16.msra.mxu1 %v3248_v5 }
  0xc1   :  { %511 = vmatmul.mubr.f32.vlgmr.msra.gmra.mrb[2].mxu0 %v3846_v46 }
  0xc2   :  { %2909 = vmatprep.mubr.msk.f32.mxu0 %vm602_vm0, %v596_v6  ;;  %v717_v6 = vld [vmem:[#allocation10 + $0x8] sm:$0x7f] }
  0xc3   :  { %582 = vmatmul.mubr.f32.vlgmr.msra.gmra.mrb[2].mxu1 %v3846_v46 }
  0xc4   :  { %2930 = vmatprep.mubr.f32.mxu1 %v716_v59 }
 0x174   :  { %v370_v17 = vpop.f32.mrb[0].mxu0 }
 0x175   :  { %v371_v19 = vadd.f32 %v370_v17, %v267_v14  ;;  %v372_v46 = vpop.f32.mrb[1].mxu0  ;;  %v3282_v14 = vpack.c.bf16 %v827_v13, %v826_v12 }
 0x176   :  { %v373_v20 = vadd.f32 %v372_v46, %v271_v15  ;;  %v441_v21 = vpop.f32.mrb[0].mxu1  ;;  %v828_v15 = vld [vmem:[%s4140_s6 + $0x20] sm:$0xff] }
 0x177   :  { %v588_v22 = vmax.f32 %v371_v19, 0.0  ;;  %v442_v23 = vadd.f32 %v441_v21, %v275_v16  ;;  %v443_v24 = vpop.f32.mrb[1].mxu1  ;;  %v829_v16 = vld [vmem:[%s4140_s6 + $0x28] sm:$0xff] }
 0x178   :  { %v589_v25 = vmax.f32 %v373_v20, 0.0  ;;  %v444_v26 = vadd.f32 %v443_v24, %v279_v18  ;;  %v3285_v17 = vpack.c.bf16 %v829_v16, %v828_v15  ;;  %v2764_v18 = vld [vmem:[%s4138_s4] ss:$0 sm:$0xff] }
 0x179   :  { %v590_v27 = vmax.f32 %v442_v23, 0.0 }
 0x17a   :  { %v3250_v28 = vpack.c.bf16 %v589_v25, %v588_v22  ;;  %v591_v29 = vmax.f32 %v444_v26, 0.0 }
 0x17c   :  { %v3254_v30 = vpack.c.bf16 %v591_v29, %v590_v27  ;;  %3251 = vmatprep.subr.bf16.mxu0 %v3250_v28 }
 0x17d   :  { %3253 = vmatpush3.bf16.msra.mxu0 %v3250_v28 }
 0x17e   :  { %3255 = vmatprep.subr.bf16.mxu0 %v3254_v30 }
 0x181   :  { %3257 = vmatpush3.bf16.msra.mxu0 %v3254_v30 }
 0x194   :  { %v512_v38 = vpop.f32.mrb[2].mxu0 }
 0x195   :  { %v513_v40 = vadd.f32 %v512_v38, %v283_v35  ;;  %v514_v41 = vpop.f32.mrb[3].mxu0 }
 0x196   :  { %v515_v42 = vadd.f32 %v514_v41, %v287_v36  ;;  %v583_v43 = vpop.f32.mrb[2].mxu1 }
 0x197   :  { %v592_v44 = vmax.f32 %v513_v40, 0.0  ;;  %v584_v45 = vadd.f32 %v583_v43, %v291_v37  ;;  %v585_v47 = vpop.f32.mrb[3].mxu1 }
 0x198   :  { %v593_v48 = vmax.f32 %v515_v42, 0.0  ;;  %v586_v49 = vadd.f32 %v585_v47, %v295_v39  ;;  %v1000_v47 = vld [vmem:[#allocation11 + $0x10] sm:$0xff] }
 0x199   :  { %v594_v50 = vmax.f32 %v584_v45, 0.0  ;;  %v999_v45 = vld [vmem:[#allocation11 + $0x8] sm:$0xff] }
 0x19a   :  { %v3258_v51 = vpack.c.bf16 %v593_v48, %v592_v44  ;;  %v595_v52 = vmax.f32 %v586_v49, 0.0  ;;  %v998_v44 = vld [vmem:[#allocation11] sm:$0xff]  ;;  %v1001_v49 = vld [vmem:[#allocation11 + $0x18] sm:$0xff] }
 0x19b   :  { %v3296_v48 = vpack.c.bf16 %v999_v45, %v998_v44 }
 0x19c   :  { %v3262_v53 = vpack.c.bf16 %v595_v52, %v594_v50  ;;  %3259 = vmatprep.subr.bf16.mxu0 %v3258_v51  ;;  %v1002_v50 = vld [vmem:[#allocation11 + $0x20] sm:$0xff]  ;;  %v1003_v52 = vld [vmem:[#allocation11 + $0x28] sm:$0xff] }
 0x19d   :  { %3261 = vmatpush3.bf16.msra.mxu0 %v3258_v51  ;;  %v3300_v51 = vpack.c.bf16 %v1001_v49, %v1000_v47 }
 0x19e   :  { %3263 = vmatprep.subr.bf16.mxu0 %v3262_v53 }
 0x1a1   :  { %3265 = vmatpush3.bf16.msra.mxu0 %v3262_v53  ;;  %v1092_v53 = vld [vmem:[#allocation13] sm:$0xff] }
 0x1a2   :  { %3278 = vmatprep.subr.bf16.mxu0 %v3669_v11 }
 0x1a4   :  { %2910 = vmatmul.mubr.msk.f32.vlgmr.msra.gmra.mrb[4].mxu0 %vm602_vm0, %v597_v54  ;;  %v1093_v54 = vld [vmem:[#allocation13 + $0x8] sm:$0xff] }
 0x1a5   :  { %2912 = vmatprep.mubr.msk.f32.mxu0 %vm602_vm0, %v598_v55  ;;  %3280 = vmatpush3.bf16.msra.mxu0 %v3279_v10  ;;  %v3911_v55 = vpack.c.bf16 %v1093_v54, %v1092_v53 }
 0x1a6   :  { %3281 = vmatprep.subr.bf16.mxu0 %v3669_v11 }
 0x1a8   :  { %2913 = vmatmul.mubr.msk.f32.gmra.mrb[6].mxu0 %vm602_vm0, %v599_v56  ;;  %v3304_v56 = vpack.c.bf16 %v1003_v52, %v1002_v50 }
 0x1a9   :  { %2915 = vmatprep.mubr.msk.f32.mxu0 %vm602_vm0, %v600_v57  ;;  %3283 = vmatpush3.bf16.msra.mxu0 %v3282_v14  ;;  %v3916_v57 = vld [vmem:[#allocation13 + $0x10] sm:$0xff] }
 0x1aa   :  { %3284 = vmatprep.subr.bf16.mxu0 %v3669_v11 }
 0x1ac   :  { %2916 = vmatmul.mubr.msk.f32.gmra.mrb[8].mxu0 %vm602_vm0, %v601_v58 }
 0x1ad   :  { %3286 = vmatpush3.bf16.msra.mxu0 %v3285_v17  ;;  %2945 = vmatprep.mubr.msk.f32.mxu0 %vm3670_vm1, %v3668_v0 }
 0x1ae   :  { %3297 = vmatprep.subr.bf16.mxu0 %v3296_v48 }
 0x277   :  { %v2911_v60 = vpop.f32.mrb[4].mxu0 }
 0x278   :  { %v687_v61 = vpop.f32.mrb[5].mxu0 }
 0x279   :  { %v3266_v62 = vpack.c.bf16 %v2911_v60, %v687_v61 }
 0x27b   :  { %3267 = vmatprep.subr.bf16.mxu1 %v3266_v62  ;;  %v2914_v63 = vpop.f32.mrb[6].mxu0 }
 0x27c   :  { %3269 = vmatpush3.bf16.xpose.msra.mxu1 %v3266_v62  ;;  %v697_v1 = vpop.f32.mrb[7].mxu0 }
 0x27d   :  { %v3270_v2 = vpack.c.bf16 %v2914_v63, %v697_v1 }
 0x27f   :  { %3271 = vmatprep.subr.bf16.mxu1 %v3270_v2  ;;  %v2917_v3 = vpop.f32.mrb[8].mxu0 }
 0x280   :  { %v707_v4 = vpop.f32.mrb[9].mxu0 }
 0x281   :  { %v3274_v5 = vpack.c.bf16 %v2917_v3, %v707_v4 }
 0x284   :  { %3273 = vmatpush3.bf16.xpose.msra.mxu1 %v3270_v2 }
 0x285   :  { %3275 = vmatprep.subr.bf16.mxu1 %v3274_v5 }
 0x28c   :  { %3277 = vmatpush3.bf16.xpose.msra.mxu1 %v3274_v5 }
 0x28d   :  { %3287 = vmatprep.subr.bf16.mxu1 %v3669_v11 }
 0x293   :  { %2931 = vmatmul.mubr.f32.vlgmr.msra.gmra.mrb[4].mxu1 %v717_v6 }
 0x294   :  { %3289 = vmatpush3.bf16.msra.mxu1 %v3279_v10  ;;  %2960 = vmatprep.mubr.msk.f32.mxu1 %vm3670_vm1, %v3668_v0 }
 0x295   :  { %3290 = vmatprep.subr.bf16.mxu1 %v3669_v11 }
 0x298   :  { %3292 = vmatpush3.bf16.msra.mxu1 %v3282_v14 }
 0x299   :  { %3293 = vmatprep.subr.bf16.mxu1 %v3669_v11 }
 0x29c   :  { %3295 = vmatpush3.bf16.msra.mxu1 %v3285_v17 }
 0x29d   :  { %3308 = vmatprep.subr.bf16.mxu1 %v3669_v11 }
 0x366   :  { %v2932_v19 = vpop.f32.mrb[4].mxu1 }
 0x367   :  { %v797_v46 = vadd.f32 %v2932_v19, %v2764_v18  ;;  %v791_v20 = vpop.f32.mrb[5].mxu1 }
 0x368   :  { %v792_v21 = vadd.f32 %v2764_v18, %v791_v20  ;;  %v2767_v18 = vld [vmem:[%s4142_s8] ss:$0 sm:$0xff]  ;;  %s3672_s8 = smov 24  }
 0x369   :  { %v3895_v22 = vmax.f32 %v797_v46, 0.0 }
 0x36a   :  { %v3897_v23 = vmax.f32 %v792_v21, 0.0 }
 0x36b   :  { %v805_v24 = vsel %vm804_vm2, %v3895_v22, 0.0  ;;  %v814_v25 = vmul.f32 %v3895_v22, %v3895_v22 }
 0x36c   :  { %v803_v26 = vsel %vm802_vm3, %v3897_v23, 0.0  ;;  %v813_v27 = vmul.f32 %v3897_v23, %v3897_v23 }
 0x36d   :  { %v816_v28 = vsel %vm804_vm2, %v814_v25, 0.0  ;;  %v806_v29 = vadd.f32 %v805_v24, %v803_v26 }
 0x36e   :  { %v815_v30 = vsel %vm802_vm3, %v813_v27, 0.0 }
 0x36f   :  { %v807_v31 = vrot.slane %v806_v29, 4  ;;  %v817_v32 = vadd.f32 %v816_v28, %v815_v30 }
 0x371   :  { %v808_v33 = vadd.f32 %v807_v31, %v806_v29  ;;  %v818_v34 = vrot.slane %v817_v32, 4 }
 0x373   :  { %v809_v35 = vrot.slane %v808_v33, 2  ;;  %v819_v36 = vadd.f32 %v818_v34, %v817_v32 }
 0x375   :  { %v810_v37 = vadd.f32 %v809_v35, %v808_v33  ;;  %v820_v38 = vrot.slane %v819_v36, 2 }
 0x377   :  { %v811_v39 = vrot.slane %v810_v37, 1  ;;  %v821_v40 = vadd.f32 %v820_v38, %v819_v36 }
 0x379   :  { %v812_v41 = vadd.f32 %v811_v39, %v810_v37  ;;  %v822_v42 = vrot.slane %v821_v40, 1 }
 0x37b   :  { %2946 = vmatmul.mubr.msk.f32.vlgmr.msra.gmra.mrb[10].mxu0 %vm802_vm3, %v812_v41  ;;  %v823_v43 = vadd.f32 %v822_v42, %v821_v40 }
 0x37c   :  { %3299 = vmatpush3.bf16.msra.mxu0 %v3296_v48 }
 0x37d   :  { %2961 = vmatmul.mubr.msk.f32.vlgmr.msra.gmra.mrb[6].mxu1 %vm802_vm3, %v823_v43  ;;  %3301 = vmatprep.subr.bf16.mxu0 %v3300_v51 }
 0x37e   :  { %2984 = vmatprep.mubr.msk.f32.mxu1 %vm3670_vm1, %v3668_v0  ;;  %3310 = vmatpush3.bf16.msra.mxu1 %v3911_v55 }
 0x37f   :  { %2982 = vmatprep.subr.mxu1 %v3668_v0 }
 0x380   :  { %3303 = vmatpush3.bf16.msra.mxu0 %v3300_v51 }
 0x381   :  { %3305 = vmatprep.subr.bf16.mxu0 %v3304_v56 }
 0x382   :  { %2983 = vmatpush3.msra.mxu1 %v3916_v57 }
 0x383   :  { %2985 = vmatmul.mubr.f32.vlgmr.msra.gmra.mrb[8].mxu1 %v3668_v0  ;;  %3314 = vmatprep.subr.bf16.mxu1 %v3669_v11 }
 0x384   :  { %3307 = vmatpush3.bf16.msra.mxu0 %v3304_v56  ;;  %3316 = vmatpush3.bf16.msra.mxu1 %v3911_v55 }
 0x385   :  { %3311 = vmatprep.subr.bf16.mxu0 %v3669_v11  ;;  %3002 = vmatprep.mubr.msk.f32.mxu1 %vm3670_vm1, %v3668_v0 }
 0x386   :  { %3000 = vmatprep.subr.mxu1 %v3668_v0 }
 0x388   :  { %3001 = vmatpush3.msra.mxu1 %v3916_v57 }
 0x389   :  { %3320 = vmatprep.subr.bf16.mxu1 %v3669_v11 }
 0x44e   :  { %v899_v58 = vpop.f32.mrb[10].mxu0 }
 0x44f   :  { %v976_v59 = vmul.f32 %v899_v58, %v899_v58  ;;  %v2947_v60 = vpop.f32.mrb[11].mxu0  ;;  %v983_v2 = vrot.slane %v899_v58, %v3855_v9 }
 0x450   :  { %v972_v61 = vpop.f32.mrb[6].mxu1 }
 0x451   :  { %v977_v62 = vsub.f32 %v972_v61, %v976_v59  ;;  %v2962_v63 = vpop.f32.mrb[7].mxu1  ;;  %v984_v4 = vsub.f32 %v3897_v23, %v983_v2  ;;  %v985_v5 = vsub.f32 %v3895_v22, %v983_v2 }
 0x453   :  { %v978_v1 = vadd.f32 1e-05, %v977_v62 }
 0x455   :  { %3375 = vrsqrt.f32 %v978_v1 }
 0x45f   :  { %v3376_v3 = vpop.eup %3375 }
 0x460   :  { %v989_v6 = vrot.slane %v3376_v3, %v3855_v9  ;;  %v1165_v9 = vpop.f32.mrb[8].mxu1 }
 0x461   :  { %v2986_v17 = vpop.f32.mrb[9].mxu1 }
 0x462   :  { %v991_v7 = vmul.f32 %v989_v6, %v985_v5  ;;  %v990_v8 = vmul.f32 %v989_v6, %v984_v4 }
 0x464   :  { %v993_v10 = vmul.f32 %v991_v7, %v991_v7  ;;  %v992_v12 = vmul.f32 %v990_v8, %v990_v8 }
 0x466   :  { %3377 = vlog2.f32 %v992_v12 }
 0x467   :  { %3379 = vlog2.f32 %v993_v10 }
 0x470   :  { %v3378_v13 = vpop.eup %3377 }
 0x471   :  { %v3380_v14 = vpop.eup %3379  ;;  %v995_v15 = vmul.f32 0.6931472, %v3378_v13 }
 0x472   :  { %v997_v16 = vmul.f32 0.6931472, %v3380_v14 }
 0x473   :  { %2975 = vmatprep.mubr.msk.f32.mxu0 %vm802_vm3, %v995_v15 }
 0x474   :  { %2976 = vmatmul.mubr.msk.f32.vlgmr.msra.gmra.mrb[12].mxu0 %vm802_vm3, %v997_v16 }
 0x475   :  { %3313 = vmatpush3.bf16.msra.mxu0 %v3911_v55  ;;  %2993 = vmatprep.mubr.msk.f32.mxu0 %vm3670_vm1, %v3668_v0 }
 0x476   :  { %2991 = vmatprep.subr.mxu0 %v3668_v0 }
 0x479   :  { %2992 = vmatpush3.msra.mxu0 %v3916_v57 }
 0x47a   :  { %3317 = vmatprep.subr.bf16.mxu0 %v3669_v11 }
 0x547   :  { %v2977_v19 = vpop.f32.mrb[12].mxu0 }
 0x548   :  { %v3942_v46 = vadd.f32 %v2977_v19, %v2767_v18  ;;  %v1083_v20 = vpop.f32.mrb[13].mxu0 }
 0x549   :  { %v3944_v21 = vadd.f32 %v2767_v18, %v1083_v20 }
 0x54b   :  { %v1169_v22 = vadd.f32 %v1165_v9, %v3944_v21 }
 0x54d   :  { %3381 = vtanh.f32 %v1169_v22  ;;  %v1170_v24 = vmul.f32 0.5, %v1169_v22 }
 0x54f   :  { %3383 = vtanh.f32 %v1170_v24 }
 0x557   :  { %v3382_v23 = vpop.eup %3381 }
 0x558   :  { %1177 = vrot.lane.b32.xlu0 %v3382_v23, %s3671_s3 }
 0x559   :  { %v3384_v25 = vpop.eup %3383 }
 0x55a   :  { %v1172_v26 = vadd.f32 1.0, %v3384_v25 }
 0x55c   :  { %v1173_v27 = vmul.f32 0.5, %v1172_v26 }
 0x55e   :  { %v1175_v30 = vmul.f32 0.0, %v1173_v27 }
 0x5ca   :  { %v1178_v28 = vpop.permute.xlu0 %1177 }
 0x5cb   :  { %v1180_v29 = vmul.f32 %v1178_v28, %v1173_v27 }
 0x5cd   :  { %1182 = vrot.lane.b32.xlu0 %v1180_v29, %s3672_s8 }
 0x63f   :  { %v1183_v31 = vpop.permute.xlu0 %1182 }
 0x640   :  { %v1185_v32 = vadd.f32 %v1183_v31, %v1175_v30 }
 0x642   :  { %3385 = vtanh.f32 %v1185_v32  ;;  %v1277_v49 = vrot.slane %v1185_v32, 7 }
 0x64c   :  { %v3386_v33 = vpop.eup %3385 }
 0x64d   :  { %1188 = vrot.lane.b32.xlu1 %v3386_v33, %s3673_s18 }
 0x6bf   :  { %v1189_v34 = vpop.permute.xlu1 %1188 }
 0x6c0   :  { %v1191_v35 = vmul.f32 %v1189_v34, %v1173_v27 }
 0x6c2   :  { %1193 = vrot.lane.b32.xlu1 %v1191_v35, %s3674_s25 }
 0x734   :  { %v1194_v36 = vpop.permute.xlu1 %1193 }
 0x735   :  { %2994 = vmatmul.mubr.msk.f32.vlgmr.msra.gmra.mrb[14].mxu0 %vm1095_vm4, %v1194_v36 }
 0x736   :  { %3319 = vmatpush3.bf16.msra.mxu0 %v3911_v55  ;;  %3011 = vmatprep.mubr.msk.f32.mxu0 %vm3670_vm1, %v3668_v0 }
 0x737   :  { %3009 = vmatprep.subr.mxu0 %v3668_v0 }
 0x73a   :  { %3010 = vmatpush3.msra.mxu0 %v3916_v57 }
 0x73b   :  { %3323 = vmatprep.subr.bf16.mxu0 %v3669_v11 }
 0x808   :  { %v1263_v37 = vpop.f32.mrb[14].mxu0 }
 0x809   :  { %v1268_v38 = vrot.slane %v1263_v37, 7  ;;  %v2995_v39 = vpop.f32.mrb[15].mxu0 }
 0x80b   :  { %v1270_v40 = vadd.f32 %v1268_v38, %v3944_v21 }
 0x80d   :  { %3387 = vtanh.f32 %v1270_v40  ;;  %v1271_v42 = vmul.f32 0.5, %v1270_v40 }
 0x80f   :  { %3389 = vtanh.f32 %v1271_v42 }
 0x817   :  { %v3388_v41 = vpop.eup %3387 }
 0x818   :  { %1281 = vrot.lane.b32.xlu0 %v3388_v41, %s3671_s3 }
 0x819   :  { %v3390_v43 = vpop.eup %3389 }
 0x81a   :  { %v1273_v44 = vadd.f32 1.0, %v3390_v43 }
 0x81c   :  { %v1274_v45 = vmul.f32 0.5, %v1273_v44 }
 0x81e   :  { %v1279_v50 = vmul.f32 %v1277_v49, %v1274_v45 }
 0x88a   :  { %v1282_v47 = vpop.permute.xlu0 %1281 }
 0x88b   :  { %v1284_v48 = vmul.f32 %v1282_v47, %v1274_v45 }
 0x88d   :  { %1286 = vrot.lane.b32.xlu1 %v1284_v48, %s3672_s8 }
 0x8ff   :  { %v1287_v51 = vpop.permute.xlu1 %1286 }
 0x900   :  { %v1289_v52 = vadd.f32 %v1287_v51, %v1279_v50 }
 0x902   :  { %3391 = vtanh.f32 %v1289_v52  ;;  %v1382_v8 = vrot.slane %v1289_v52, 7 }
 0x90c   :  { %v3392_v53 = vpop.eup %3391 }
 0x90d   :  { %1292 = vrot.lane.b32.xlu0 %v3392_v53, %s3673_s18 }
 0x97f   :  { %v1293_v54 = vpop.permute.xlu0 %1292 }
 0x980   :  { %v1295_v56 = vmul.f32 %v1293_v54, %v1274_v45 }
 0x982   :  { %v1297_v58 = vrot.slane %v1295_v56, 1 }
 0x984   :  { %1298 = vrot.lane.b32.xlu1 %v1297_v58, %s3674_s25 }
 0x9f6   :  { %v1299_v59 = vpop.permute.xlu1 %1298 }
 0x9f7   :  { %3003 = vmatmul.mubr.msk.f32.vlgmr.msra.gmra.mrb[10].mxu1 %vm1095_vm4, %v1299_v59 }
 0x9f8   :  { %3322 = vmatpush3.bf16.msra.mxu1 %v3911_v55  ;;  %3020 = vmatprep.mubr.msk.f32.mxu1 %vm3670_vm1, %v3668_v0 }
 0x9f9   :  { %3018 = vmatprep.subr.mxu1 %v3668_v0 }
 0x9fc   :  { %3019 = vmatpush3.msra.mxu1 %v3916_v57 }
 0x9fd   :  { %3326 = vmatprep.subr.bf16.mxu1 %v3669_v11 }
 0xaca   :  { %v1368_v60 = vpop.f32.mrb[10].mxu1 }
 0xacb   :  { %v1373_v61 = vrot.slane %v1368_v60, 6  ;;  %v3004_v62 = vpop.f32.mrb[11].mxu1 }
 0xacd   :  { %v1375_v63 = vadd.f32 %v1373_v61, %v3944_v21 }
 0xacf   :  { %3393 = vtanh.f32 %v1375_v63  ;;  %v1376_v2 = vmul.f32 0.5, %v1375_v63 }
 0xad1   :  { %3395 = vtanh.f32 %v1376_v2 }
 0xad9   :  { %v3394_v1 = vpop.eup %3393 }
 0xada   :  { %1386 = vrot.lane.b32.xlu0 %v3394_v1, %s3671_s3 }
 0xadb   :  { %v3396_v3 = vpop.eup %3395 }
 0xadc   :  { %v1378_v4 = vadd.f32 1.0, %v3396_v3 }
 0xade   :  { %v1379_v5 = vmul.f32 0.5, %v1378_v4 }
 0xae0   :  { %v1384_v10 = vmul.f32 %v1382_v8, %v1379_v5 }
 0xb4c   :  { %v1387_v6 = vpop.permute.xlu0 %1386 }
 0xb4d   :  { %v1389_v7 = vmul.f32 %v1387_v6, %v1379_v5 }
 0xb4f   :  { %1391 = vrot.lane.b32.xlu1 %v1389_v7, %s3672_s8 }
 0xbc1   :  { %v1392_v12 = vpop.permute.xlu1 %1391 }
 0xbc2   :  { %v1394_v13 = vadd.f32 %v1392_v12, %v1384_v10 }
 0xbc4   :  { %3397 = vtanh.f32 %v1394_v13  ;;  %v1487_v30 = vrot.slane %v1394_v13, 7 }
 0xbce   :  { %v3398_v14 = vpop.eup %3397 }
 0xbcf   :  { %1397 = vrot.lane.b32.xlu0 %v3398_v14, %s3673_s18 }
 0xc41   :  { %v1398_v15 = vpop.permute.xlu0 %1397 }
 0xc42   :  { %v1400_v16 = vmul.f32 %v1398_v15, %v1379_v5 }
 0xc44   :  { %v1402_v9 = vrot.slane %v1400_v16, 2 }
 0xc46   :  { %1403 = vrot.lane.b32.xlu1 %v1402_v9, %s3674_s25 }
 0xcb8   :  { %v1404_v17 = vpop.permute.xlu1 %1403 }
 0xcb9   :  { %3012 = vmatmul.mubr.msk.f32.vlgmr.msra.gmra.mrb[16].mxu0 %vm1095_vm4, %v1404_v17 }
 0xcba   :  { %3325 = vmatpush3.bf16.msra.mxu0 %v3911_v55  ;;  %3029 = vmatprep.mubr.msk.f32.mxu0 %vm3670_vm1, %v3668_v0 }
 0xcbb   :  { %3027 = vmatprep.subr.mxu0 %v3668_v0 }
 0xcbe   :  { %3028 = vmatpush3.msra.mxu0 %v3916_v57 }
 0xcbf   :  { %3329 = vmatprep.subr.bf16.mxu0 %v3669_v11 }
 0xd8c   :  { %v1473_v18 = vpop.f32.mrb[16].mxu0 }
 0xd8d   :  { %v1478_v19 = vrot.slane %v1473_v18, 5  ;;  %v3013_v20 = vpop.f32.mrb[17].mxu0 }
 0xd8f   :  { %v1480_v22 = vadd.f32 %v1478_v19, %v3944_v21 }
 0xd91   :  { %3399 = vtanh.f32 %v1480_v22  ;;  %v1481_v24 = vmul.f32 0.5, %v1480_v22 }
 0xd93   :  { %3401 = vtanh.f32 %v1481_v24 }
 0xd9b   :  { %v3400_v23 = vpop.eup %3399 }
 0xd9c   :  { %1491 = vrot.lane.b32.xlu0 %v3400_v23, %s3671_s3 }
 0xd9d   :  { %v3402_v25 = vpop.eup %3401 }
 0xd9e   :  { %v1483_v26 = vadd.f32 1.0, %v3402_v25 }
 0xda0   :  { %v1484_v27 = vmul.f32 0.5, %v1483_v26 }
 0xda2   :  { %v1489_v31 = vmul.f32 %v1487_v30, %v1484_v27 }
 0xe0e   :  { %v1492_v28 = vpop.permute.xlu0 %1491 }
 0xe0f   :  { %v1494_v29 = vmul.f32 %v1492_v28, %v1484_v27 }
 0xe11   :  { %1496 = vrot.lane.b32.xlu1 %v1494_v29, %s3672_s8 }
 0xe83   :  { %v1497_v32 = vpop.permute.xlu1 %1496 }
 0xe84   :  { %v1499_v33 = vadd.f32 %v1497_v32, %v1489_v31 }
 0xe86   :  { %3403 = vtanh.f32 %v1499_v33  ;;  %v1592_v51 = vrot.slane %v1499_v33, 7 }
 0xe90   :  { %v3404_v34 = vpop.eup %3403 }
 0xe91   :  { %1502 = vrot.lane.b32.xlu0 %v3404_v34, %s3673_s18 }
 0xf03   :  { %v1503_v35 = vpop.permute.xlu0 %1502 }
 0xf04   :  { %v1505_v36 = vmul.f32 %v1503_v35, %v1484_v27 }
 0xf06   :  { %v1507_v37 = vrot.slane %v1505_v36, 3 }
 0xf08   :  { %1508 = vrot.lane.b32.xlu1 %v1507_v37, %s3674_s25 }
 0xf7a   :  { %v1509_v38 = vpop.permute.xlu1 %1508 }
 0xf7b   :  { %3021 = vmatmul.mubr.msk.f32.vlgmr.msra.gmra.mrb[12].mxu1 %vm1095_vm4, %v1509_v38 }
 0xf7c   :  { %3328 = vmatpush3.bf16.msra.mxu1 %v3911_v55  ;;  %3038 = vmatprep.mubr.msk.f32.mxu1 %vm3670_vm1, %v3668_v0 }
 0xf7d   :  { %3036 = vmatprep.subr.mxu1 %v3668_v0 }
 0xf80   :  { %3037 = vmatpush3.msra.mxu1 %v3916_v57 }
 0xf81   :  { %3332 = vmatprep.subr.bf16.mxu1 %v3669_v11 }
0x104e   :  { %v1578_v39 = vpop.f32.mrb[12].mxu1 }
0x104f   :  { %v1583_v40 = vrot.slane %v1578_v39, 4  ;;  %v3022_v41 = vpop.f32.mrb[13].mxu1 }
0x1051   :  { %v1585_v42 = vadd.f32 %v1583_v40, %v3944_v21 }
0x1053   :  { %3405 = vtanh.f32 %v1585_v42  ;;  %v1586_v44 = vmul.f32 0.5, %v1585_v42 }
0x1055   :  { %3407 = vtanh.f32 %v1586_v44 }
0x105d   :  { %v3406_v43 = vpop.eup %3405 }
0x105e   :  { %1596 = vrot.lane.b32.xlu0 %v3406_v43, %s3671_s3 }
0x105f   :  { %v3408_v45 = vpop.eup %3407 }
0x1060   :  { %v1588_v47 = vadd.f32 1.0, %v3408_v45 }
0x1062   :  { %v1589_v48 = vmul.f32 0.5, %v1588_v47 }
0x1064   :  { %v1594_v52 = vmul.f32 %v1592_v51, %v1589_v48 }
0x10d0   :  { %v1597_v49 = vpop.permute.xlu0 %1596 }
0x10d1   :  { %v1599_v50 = vmul.f32 %v1597_v49, %v1589_v48 }
0x10d3   :  { %1601 = vrot.lane.b32.xlu1 %v1599_v50, %s3672_s8 }
0x1145   :  { %v1602_v53 = vpop.permute.xlu1 %1601 }
0x1146   :  { %v1604_v54 = vadd.f32 %v1602_v53, %v1594_v52 }
0x1148   :  { %3409 = vtanh.f32 %v1604_v54  ;;  %v1697_v12 = vrot.slane %v1604_v54, 7 }
0x1152   :  { %v3410_v56 = vpop.eup %3409 }
0x1153   :  { %1607 = vrot.lane.b32.xlu0 %v3410_v56, %s3673_s18 }
0x11c5   :  { %v1608_v58 = vpop.permute.xlu0 %1607 }
0x11c6   :  { %v1610_v59 = vmul.f32 %v1608_v58, %v1589_v48 }
0x11c8   :  { %v1612_v60 = vrot.slane %v1610_v59, 4 }
0x11ca   :  { %1613 = vrot.lane.b32.xlu1 %v1612_v60, %s3674_s25 }
0x123c   :  { %v1614_v61 = vpop.permute.xlu1 %1613 }
0x123d   :  { %3030 = vmatmul.mubr.msk.f32.vlgmr.msra.gmra.mrb[18].mxu0 %vm1095_vm4, %v1614_v61 }
0x123e   :  { %3331 = vmatpush3.bf16.msra.mxu0 %v3911_v55  ;;  %3047 = vmatprep.mubr.msk.f32.mxu0 %vm3670_vm1, %v3668_v0 }
0x123f   :  { %3045 = vmatprep.subr.mxu0 %v3668_v0 }
0x1242   :  { %3046 = vmatpush3.msra.mxu0 %v3916_v57 }
0x1243   :  { %3335 = vmatprep.subr.bf16.mxu0 %v3669_v11 }
0x1310   :  { %v1683_v62 = vpop.f32.mrb[18].mxu0 }
0x1311   :  { %v1688_v63 = vrot.slane %v1683_v62, 3  ;;  %v3031_v1 = vpop.f32.mrb[19].mxu0 }
0x1313   :  { %v1690_v2 = vadd.f32 %v1688_v63, %v3944_v21 }
0x1315   :  { %3411 = vtanh.f32 %v1690_v2  ;;  %v1691_v4 = vmul.f32 0.5, %v1690_v2 }
0x1317   :  { %3413 = vtanh.f32 %v1691_v4 }
0x131f   :  { %v3412_v3 = vpop.eup %3411 }
0x1320   :  { %1701 = vrot.lane.b32.xlu0 %v3412_v3, %s3671_s3 }
0x1321   :  { %v3414_v5 = vpop.eup %3413 }
0x1322   :  { %v1693_v6 = vadd.f32 1.0, %v3414_v5 }
0x1324   :  { %v1694_v7 = vmul.f32 0.5, %v1693_v6 }
0x1326   :  { %v1699_v13 = vmul.f32 %v1697_v12, %v1694_v7 }
0x1392   :  { %v1702_v8 = vpop.permute.xlu0 %1701 }
0x1393   :  { %v1704_v10 = vmul.f32 %v1702_v8, %v1694_v7 }
0x1395   :  { %1706 = vrot.lane.b32.xlu1 %v1704_v10, %s3672_s8 }
0x1407   :  { %v1707_v14 = vpop.permute.xlu1 %1706 }
0x1408   :  { %v1709_v15 = vadd.f32 %v1707_v14, %v1699_v13 }
0x140a   :  { %3415 = vtanh.f32 %v1709_v15  ;;  %v1802_v32 = vrot.slane %v1709_v15, 7 }
0x1414   :  { %v3416_v16 = vpop.eup %3415 }
0x1415   :  { %1712 = vrot.lane.b32.xlu0 %v3416_v16, %s3673_s18 }
0x1487   :  { %v1713_v9 = vpop.permute.xlu0 %1712 }
0x1488   :  { %v1715_v17 = vmul.f32 %v1713_v9, %v1694_v7 }
0x148a   :  { %v1717_v18 = vrot.slane %v1715_v17, 5 }
0x148c   :  { %1718 = vrot.lane.b32.xlu1 %v1717_v18, %s3674_s25 }
0x14fe   :  { %v1719_v19 = vpop.permute.xlu1 %1718 }
0x14ff   :  { %3039 = vmatmul.mubr.msk.f32.vlgmr.msra.gmra.mrb[14].mxu1 %vm1095_vm4, %v1719_v19 }
0x1500   :  { %3334 = vmatpush3.bf16.msra.mxu1 %v3911_v55  ;;  %3056 = vmatprep.mubr.msk.f32.mxu1 %vm3670_vm1, %v3668_v0 }
0x1501   :  { %3054 = vmatprep.subr.mxu1 %v3668_v0 }
0x1504   :  { %3055 = vmatpush3.msra.mxu1 %v3916_v57 }
0x1505   :  { %3338 = vmatprep.subr.bf16.mxu1 %v3669_v11 }
0x15d2   :  { %v1788_v20 = vpop.f32.mrb[14].mxu1 }
0x15d3   :  { %v1793_v22 = vrot.slane %v1788_v20, 2  ;;  %v3040_v23 = vpop.f32.mrb[15].mxu1 }
0x15d5   :  { %v1795_v24 = vadd.f32 %v1793_v22, %v3944_v21 }
0x15d7   :  { %3417 = vtanh.f32 %v1795_v24  ;;  %v1796_v26 = vmul.f32 0.5, %v1795_v24 }
0x15d9   :  { %3419 = vtanh.f32 %v1796_v26 }
0x15e1   :  { %v3418_v25 = vpop.eup %3417 }
0x15e2   :  { %1806 = vrot.lane.b32.xlu0 %v3418_v25, %s3671_s3 }
0x15e3   :  { %v3420_v27 = vpop.eup %3419 }
0x15e4   :  { %v1798_v28 = vadd.f32 1.0, %v3420_v27 }
0x15e6   :  { %v1799_v29 = vmul.f32 0.5, %v1798_v28 }
0x15e8   :  { %v1804_v33 = vmul.f32 %v1802_v32, %v1799_v29 }
0x1654   :  { %v1807_v30 = vpop.permute.xlu0 %1806 }
0x1655   :  { %v1809_v31 = vmul.f32 %v1807_v30, %v1799_v29 }
0x1657   :  { %1811 = vrot.lane.b32.xlu1 %v1809_v31, %s3672_s8 }
0x16c9   :  { %v1812_v34 = vpop.permute.xlu1 %1811 }
0x16ca   :  { %v1814_v35 = vadd.f32 %v1812_v34, %v1804_v33 }
0x16cc   :  { %3421 = vtanh.f32 %v1814_v35  ;;  %v1907_v53 = vrot.slane %v1814_v35, 7 }
0x16d6   :  { %v3422_v36 = vpop.eup %3421 }
0x16d7   :  { %1817 = vrot.lane.b32.xlu0 %v3422_v36, %s3673_s18 }
0x1749   :  { %v1818_v37 = vpop.permute.xlu0 %1817 }
0x174a   :  { %v1820_v38 = vmul.f32 %v1818_v37, %v1799_v29 }
0x174c   :  { %v1822_v39 = vrot.slane %v1820_v38, 6 }
0x174e   :  { %1823 = vrot.lane.b32.xlu1 %v1822_v39, %s3674_s25 }
0x17c0   :  { %v1824_v40 = vpop.permute.xlu1 %1823 }
0x17c1   :  { %3048 = vmatmul.mubr.msk.f32.vlgmr.msra.gmra.mrb[20].mxu0 %vm1095_vm4, %v1824_v40 }
0x17c2   :  { %3337 = vmatpush3.bf16.msra.mxu0 %v3911_v55  ;;  %3065 = vmatprep.mubr.msk.f32.mxu0 %vm3670_vm1, %v3668_v0 }
0x17c3   :  { %3063 = vmatprep.subr.mxu0 %v3668_v0 }
0x17c6   :  { %3064 = vmatpush3.msra.mxu0 %v3916_v57 }
0x17c7   :  { %3341 = vmatprep.subr.bf16.mxu0 %v3669_v11 }
0x1894   :  { %v1893_v41 = vpop.f32.mrb[20].mxu0 }
0x1895   :  { %v1898_v42 = vrot.slane %v1893_v41, 1  ;;  %v3049_v43 = vpop.f32.mrb[21].mxu0 }
0x1897   :  { %v1900_v44 = vadd.f32 %v1898_v42, %v3944_v21 }
0x1899   :  { %3423 = vtanh.f32 %v1900_v44  ;;  %v1901_v47 = vmul.f32 0.5, %v1900_v44 }
0x189b   :  { %3425 = vtanh.f32 %v1901_v47 }
0x18a3   :  { %v3424_v45 = vpop.eup %3423 }
0x18a4   :  { %1911 = vrot.lane.b32.xlu0 %v3424_v45, %s3671_s3 }
0x18a5   :  { %v3426_v48 = vpop.eup %3425 }
0x18a6   :  { %v1903_v49 = vadd.f32 1.0, %v3426_v48 }
0x18a8   :  { %v1904_v50 = vmul.f32 0.5, %v1903_v49 }
0x18aa   :  { %v1909_v54 = vmul.f32 %v1907_v53, %v1904_v50 }
0x1916   :  { %v1912_v51 = vpop.permute.xlu0 %1911 }
0x1917   :  { %v1914_v52 = vmul.f32 %v1912_v51, %v1904_v50 }
0x1919   :  { %1916 = vrot.lane.b32.xlu1 %v1914_v52, %s3672_s8 }
0x198b   :  { %v1917_v56 = vpop.permute.xlu1 %1916 }
0x198c   :  { %v1919_v58 = vadd.f32 %v1917_v56, %v1909_v54 }
0x198e   :  { %3427 = vtanh.f32 %v1919_v58  ;;  %v2009_v12 = vrot.slane %v1919_v58, 7 }
0x1998   :  { %v3428_v59 = vpop.eup %3427 }
0x1999   :  { %1922 = vrot.lane.b32.xlu0 %v3428_v59, %s3673_s18 }
0x1a0b   :  { %v1923_v21 = vpop.permute.xlu0 %1922 }
0x1a0c   :  { %v1925_v60 = vmul.f32 %v1923_v21, %v1904_v50 }
0x1a0e   :  { %v1927_v61 = vrot.slane %v1925_v60, 7 }
0x1a10   :  { %1928 = vrot.lane.b32.xlu1 %v1927_v61, %s3674_s25 }
0x1a82   :  { %v1929_v62 = vpop.permute.xlu1 %1928 }
0x1a83   :  { %3057 = vmatmul.mubr.msk.f32.vlgmr.msra.gmra.mrb[16].mxu1 %vm1095_vm4, %v1929_v62 }
0x1a84   :  { %3340 = vmatpush3.bf16.msra.mxu1 %v3911_v55  ;;  %3074 = vmatprep.mubr.msk.f32.mxu1 %vm3670_vm1, %v3668_v0 }
0x1a85   :  { %3072 = vmatprep.subr.mxu1 %v3668_v0 }
0x1a88   :  { %3073 = vmatpush3.msra.mxu1 %v3916_v57 }
0x1a89   :  { %3344 = vmatprep.subr.bf16.mxu1 %v3669_v11 }
0x1b56   :  { %v1998_v63 = vpop.f32.mrb[16].mxu1 }
0x1b57   :  { %v2002_v1 = vadd.f32 %v1998_v63, %v3942_v46  ;;  %v3058_v2 = vpop.f32.mrb[17].mxu1 }
0x1b59   :  { %3429 = vtanh.f32 %v2002_v1  ;;  %v2003_v4 = vmul.f32 0.5, %v2002_v1 }
0x1b5b   :  { %3431 = vtanh.f32 %v2003_v4 }
0x1b63   :  { %v3430_v3 = vpop.eup %3429 }
0x1b64   :  { %2013 = vrot.lane.b32.xlu0 %v3430_v3, %s3671_s3 }
0x1b65   :  { %v3432_v5 = vpop.eup %3431 }
0x1b66   :  { %v2005_v6 = vadd.f32 1.0, %v3432_v5 }
0x1b68   :  { %v2006_v7 = vmul.f32 0.5, %v2005_v6 }
0x1b6a   :  { %v2011_v13 = vmul.f32 %v2009_v12, %v2006_v7 }
0x1bd6   :  { %v2014_v8 = vpop.permute.xlu0 %2013 }
0x1bd7   :  { %v2016_v10 = vmul.f32 %v2014_v8, %v2006_v7 }
0x1bd9   :  { %2018 = vrot.lane.b32.xlu1 %v2016_v10, %s3672_s8 }
0x1c4b   :  { %v2019_v14 = vpop.permute.xlu1 %2018 }
0x1c4c   :  { %v2021_v15 = vadd.f32 %v2019_v14, %v2011_v13 }
0x1c4e   :  { %3433 = vtanh.f32 %v2021_v15  ;;  %v2113_v31 = vrot.slane %v2021_v15, 7 }
0x1c58   :  { %v3434_v16 = vpop.eup %3433 }
0x1c59   :  { %2024 = vrot.lane.b32.xlu0 %v3434_v16, %s3673_s18 }
0x1ccb   :  { %v2025_v9 = vpop.permute.xlu0 %2024 }
0x1ccc   :  { %v2027_v17 = vmul.f32 %v2025_v9, %v2006_v7 }
0x1cce   :  { %2029 = vrot.lane.b32.xlu1 %v2027_v17, %s3674_s25 }
0x1d40   :  { %v2030_v18 = vpop.permute.xlu1 %2029 }
0x1d41   :  { %3066 = vmatmul.mubr.msk.f32.vlgmr.msra.gmra.mrb[22].mxu0 %vm1095_vm4, %v2030_v18 }
0x1d42   :  { %3343 = vmatpush3.bf16.msra.mxu0 %v3911_v55  ;;  %3083 = vmatprep.mubr.msk.f32.mxu0 %vm3670_vm1, %v3668_v0 }
0x1d43   :  { %3081 = vmatprep.subr.mxu0 %v3668_v0 }
0x1d46   :  { %3082 = vmatpush3.msra.mxu0 %v3916_v57 }
0x1d47   :  { %3347 = vmatprep.subr.bf16.mxu0 %v3669_v11 }
0x1e14   :  { %v2099_v19 = vpop.f32.mrb[22].mxu0 }
0x1e15   :  { %v2104_v20 = vrot.slane %v2099_v19, 7  ;;  %v3067_v22 = vpop.f32.mrb[23].mxu0 }
0x1e17   :  { %v2106_v23 = vadd.f32 %v2104_v20, %v3942_v46 }
0x1e19   :  { %3435 = vtanh.f32 %v2106_v23  ;;  %v2107_v25 = vmul.f32 0.5, %v2106_v23 }
0x1e1b   :  { %3437 = vtanh.f32 %v2107_v25 }
0x1e23   :  { %v3436_v24 = vpop.eup %3435 }
0x1e24   :  { %2117 = vrot.lane.b32.xlu0 %v3436_v24, %s3671_s3 }
0x1e25   :  { %v3438_v26 = vpop.eup %3437 }
0x1e26   :  { %v2109_v27 = vadd.f32 1.0, %v3438_v26 }
0x1e28   :  { %v2110_v28 = vmul.f32 0.5, %v2109_v27 }
0x1e2a   :  { %v2115_v32 = vmul.f32 %v2113_v31, %v2110_v28 }
0x1e96   :  { %v2118_v29 = vpop.permute.xlu0 %2117 }
0x1e97   :  { %v2120_v30 = vmul.f32 %v2118_v29, %v2110_v28 }
0x1e99   :  { %2122 = vrot.lane.b32.xlu1 %v2120_v30, %s3672_s8 }
0x1f0b   :  { %v2123_v33 = vpop.permute.xlu1 %2122 }
0x1f0c   :  { %v2125_v34 = vadd.f32 %v2123_v33, %v2115_v32 }
0x1f0e   :  { %3439 = vtanh.f32 %v2125_v34  ;;  %v2218_v52 = vrot.slane %v2125_v34, 7 }
0x1f18   :  { %v3440_v35 = vpop.eup %3439 }
0x1f19   :  { %2128 = vrot.lane.b32.xlu0 %v3440_v35, %s3673_s18 }
0x1f8b   :  { %v2129_v36 = vpop.permute.xlu0 %2128 }
0x1f8c   :  { %v2131_v37 = vmul.f32 %v2129_v36, %v2110_v28 }
0x1f8e   :  { %v2133_v38 = vrot.slane %v2131_v37, 1 }
0x1f90   :  { %2134 = vrot.lane.b32.xlu1 %v2133_v38, %s3674_s25 }
0x2002   :  { %v2135_v39 = vpop.permute.xlu1 %2134 }
0x2003   :  { %3075 = vmatmul.mubr.msk.f32.vlgmr.msra.gmra.mrb[18].mxu1 %vm1095_vm4, %v2135_v39 }
0x2004   :  { %3346 = vmatpush3.bf16.msra.mxu1 %v3911_v55  ;;  %3092 = vmatprep.mubr.msk.f32.mxu1 %vm3670_vm1, %v3668_v0 }
0x2005   :  { %3090 = vmatprep.subr.mxu1 %v3668_v0 }
0x2008   :  { %3091 = vmatpush3.msra.mxu1 %v3916_v57 }
0x2009   :  { %3350 = vmatprep.subr.bf16.mxu1 %v3669_v11 }
0x20d6   :  { %v2204_v40 = vpop.f32.mrb[18].mxu1 }
0x20d7   :  { %v2209_v41 = vrot.slane %v2204_v40, 6  ;;  %v3076_v42 = vpop.f32.mrb[19].mxu1 }
0x20d9   :  { %v2211_v43 = vadd.f32 %v2209_v41, %v3942_v46 }
0x20db   :  { %3441 = vtanh.f32 %v2211_v43  ;;  %v2212_v45 = vmul.f32 0.5, %v2211_v43 }
0x20dd   :  { %3443 = vtanh.f32 %v2212_v45 }
0x20e5   :  { %v3442_v44 = vpop.eup %3441 }
0x20e6   :  { %2222 = vrot.lane.b32.xlu0 %v3442_v44, %s3671_s3 }
0x20e7   :  { %v3444_v47 = vpop.eup %3443 }
0x20e8   :  { %v2214_v48 = vadd.f32 1.0, %v3444_v47 }
0x20ea   :  { %v2215_v49 = vmul.f32 0.5, %v2214_v48 }
0x20ec   :  { %v2220_v53 = vmul.f32 %v2218_v52, %v2215_v49 }
0x2158   :  { %v2223_v50 = vpop.permute.xlu0 %2222 }
0x2159   :  { %v2225_v51 = vmul.f32 %v2223_v50, %v2215_v49 }
0x215b   :  { %2227 = vrot.lane.b32.xlu1 %v2225_v51, %s3672_s8 }
0x21cd   :  { %v2228_v54 = vpop.permute.xlu1 %2227 }
0x21ce   :  { %v2230_v56 = vadd.f32 %v2228_v54, %v2220_v53 }
0x21d0   :  { %3445 = vtanh.f32 %v2230_v56  ;;  %v2323_v12 = vrot.slane %v2230_v56, 7 }
0x21da   :  { %v3446_v58 = vpop.eup %3445 }
0x21db   :  { %2233 = vrot.lane.b32.xlu0 %v3446_v58, %s3673_s18 }
0x224d   :  { %v2234_v59 = vpop.permute.xlu0 %2233 }
0x224e   :  { %v2236_v21 = vmul.f32 %v2234_v59, %v2215_v49 }
0x2250   :  { %v2238_v60 = vrot.slane %v2236_v21, 2 }
0x2252   :  { %2239 = vrot.lane.b32.xlu1 %v2238_v60, %s3674_s25 }
0x22c4   :  { %v2240_v61 = vpop.permute.xlu1 %2239 }
0x22c5   :  { %3084 = vmatmul.mubr.msk.f32.vlgmr.msra.gmra.mrb[24].mxu0 %vm1095_vm4, %v2240_v61 }
0x22c6   :  { %3349 = vmatpush3.bf16.msra.mxu0 %v3911_v55  ;;  %3101 = vmatprep.mubr.msk.f32.mxu0 %vm3670_vm1, %v3668_v0 }
0x22c7   :  { %3099 = vmatprep.subr.mxu0 %v3668_v0 }
0x22ca   :  { %3100 = vmatpush3.msra.mxu0 %v3916_v57 }
0x22cb   :  { %3353 = vmatprep.subr.bf16.mxu0 %v3669_v11 }
0x2398   :  { %v2309_v62 = vpop.f32.mrb[24].mxu0 }
0x2399   :  { %v2314_v63 = vrot.slane %v2309_v62, 5  ;;  %v3085_v1 = vpop.f32.mrb[25].mxu0 }
0x239b   :  { %v2316_v2 = vadd.f32 %v2314_v63, %v3942_v46 }
0x239d   :  { %3447 = vtanh.f32 %v2316_v2  ;;  %v2317_v4 = vmul.f32 0.5, %v2316_v2 }
0x239f   :  { %3449 = vtanh.f32 %v2317_v4 }
0x23a7   :  { %v3448_v3 = vpop.eup %3447 }
0x23a8   :  { %2327 = vrot.lane.b32.xlu0 %v3448_v3, %s3671_s3 }
0x23a9   :  { %v3450_v5 = vpop.eup %3449 }
0x23aa   :  { %v2319_v6 = vadd.f32 1.0, %v3450_v5 }
0x23ac   :  { %v2320_v7 = vmul.f32 0.5, %v2319_v6 }
0x23ae   :  { %v2325_v11 = vmul.f32 %v2323_v12, %v2320_v7 }
0x241a   :  { %v2328_v8 = vpop.permute.xlu0 %2327 }
0x241b   :  { %v2330_v10 = vmul.f32 %v2328_v8, %v2320_v7 }
0x241d   :  { %2332 = vrot.lane.b32.xlu1 %v2330_v10, %s3672_s8 }
0x248f   :  { %v2333_v13 = vpop.permute.xlu1 %2332 }
0x2490   :  { %v2335_v14 = vadd.f32 %v2333_v13, %v2325_v11  ;;  %v2658_v13 = vld [vmem:[%s4144_s10 + $0x8] sm:$0xff] }
0x2492   :  { %3451 = vtanh.f32 %v2335_v14  ;;  %v2428_v30 = vrot.slane %v2335_v14, 7 }
0x249c   :  { %v3452_v15 = vpop.eup %3451 }
0x249d   :  { %2338 = vrot.lane.b32.xlu0 %v3452_v15, %s3673_s18  ;;  %v2659_v15 = vld [vmem:[%s4144_s10 + $0x10] sm:$0xff] }
0x250f   :  { %v2339_v16 = vpop.permute.xlu0 %2338 }
0x2510   :  { %v2341_v9 = vmul.f32 %v2339_v16, %v2320_v7 }
0x2512   :  { %v2343_v17 = vrot.slane %v2341_v9, 3 }
0x2514   :  { %2344 = vrot.lane.b32.xlu1 %v2343_v17, %s3674_s25 }
0x2586   :  { %v2345_v18 = vpop.permute.xlu1 %2344 }
0x2587   :  { %3093 = vmatmul.mubr.msk.f32.vlgmr.msra.gmra.mrb[20].mxu1 %vm1095_vm4, %v2345_v18 }
0x2588   :  { %3352 = vmatpush3.bf16.msra.mxu1 %v3911_v55  ;;  %3110 = vmatprep.mubr.msk.f32.mxu1 %vm3670_vm1, %v3668_v0 }
0x2589   :  { %3108 = vmatprep.subr.mxu1 %v3668_v0 }
0x258c   :  { %3109 = vmatpush3.msra.mxu1 %v3916_v57 }
0x265a   :  { %v2414_v19 = vpop.f32.mrb[20].mxu1 }
0x265b   :  { %v2419_v20 = vrot.slane %v2414_v19, 4  ;;  %v3094_v22 = vpop.f32.mrb[21].mxu1 }
0x265d   :  { %v2421_v23 = vadd.f32 %v2419_v20, %v3942_v46 }
0x265f   :  { %3453 = vtanh.f32 %v2421_v23  ;;  %v2422_v25 = vmul.f32 0.5, %v2421_v23 }
0x2661   :  { %3455 = vtanh.f32 %v2422_v25 }
0x2669   :  { %v3454_v24 = vpop.eup %3453 }
0x266a   :  { %2432 = vrot.lane.b32.xlu0 %v3454_v24, %s3671_s3 }
0x266b   :  { %v3456_v26 = vpop.eup %3455 }
0x266c   :  { %v2424_v55 = vadd.f32 1.0, %v3456_v26 }
0x266e   :  { %v2425_v27 = vmul.f32 0.5, %v2424_v55 }
0x2670   :  { %v2430_v57 = vmul.f32 %v2428_v30, %v2425_v27 }
0x26dc   :  { %v2433_v28 = vpop.permute.xlu0 %2432 }
0x26dd   :  { %v2435_v29 = vmul.f32 %v2433_v28, %v2425_v27 }
0x26df   :  { %2437 = vrot.lane.b32.xlu1 %v2435_v29, %s3672_s8 }
0x2751   :  { %v2438_v31 = vpop.permute.xlu1 %2437 }
0x2752   :  { %v2440_v32 = vadd.f32 %v2438_v31, %v2430_v57 }
0x2754   :  { %3457 = vtanh.f32 %v2440_v32  ;;  %v2533_v50 = vrot.slane %v2440_v32, 7 }
0x275e   :  { %v3458_v33 = vpop.eup %3457 }
0x275f   :  { %2443 = vrot.lane.b32.xlu0 %v3458_v33, %s3673_s18 }
0x27d1   :  { %v2444_v34 = vpop.permute.xlu0 %2443 }
0x27d2   :  { %v2446_v35 = vmul.f32 %v2444_v34, %v2425_v27 }
0x27d4   :  { %v2448_v36 = vrot.slane %v2446_v35, 4 }
0x27d6   :  { %2449 = vrot.lane.b32.xlu1 %v2448_v36, %s3674_s25 }
0x2848   :  { %v2450_v37 = vpop.permute.xlu1 %2449 }
0x2849   :  { %3102 = vmatmul.mubr.msk.f32.vlgmr.msra.gmra.mrb[26].mxu0 %vm1095_vm4, %v2450_v37 }
0x284a   :  { %3119 = vmatprep.mubr.msk.f32.mxu0 %vm3670_vm1, %v3668_v0 }
0x291c   :  { %v2519_v38 = vpop.f32.mrb[26].mxu0 }
0x291d   :  { %v2524_v39 = vrot.slane %v2519_v38, 3  ;;  %v3103_v40 = vpop.f32.mrb[27].mxu0 }
0x291f   :  { %v2526_v41 = vadd.f32 %v2524_v39, %v3942_v46 }
0x2921   :  { %3459 = vtanh.f32 %v2526_v41  ;;  %v2527_v43 = vmul.f32 0.5, %v2526_v41 }
0x2923   :  { %3461 = vtanh.f32 %v2527_v43 }
0x292b   :  { %v3460_v42 = vpop.eup %3459 }
0x292c   :  { %2537 = vrot.lane.b32.xlu0 %v3460_v42, %s3671_s3 }
0x292d   :  { %v3462_v44 = vpop.eup %3461 }
0x292e   :  { %v2529_v45 = vadd.f32 1.0, %v3462_v44 }
0x2930   :  { %v2530_v47 = vmul.f32 0.5, %v2529_v45 }
0x2932   :  { %v2535_v51 = vmul.f32 %v2533_v50, %v2530_v47 }
0x299e   :  { %v2538_v48 = vpop.permute.xlu0 %2537 }
0x299f   :  { %v2540_v49 = vmul.f32 %v2538_v48, %v2530_v47 }
0x29a1   :  { %2542 = vrot.lane.b32.xlu1 %v2540_v49, %s3672_s8 }
0x2a13   :  { %v2543_v52 = vpop.permute.xlu1 %2542 }
0x2a14   :  { %v2545_v53 = vadd.f32 %v2543_v52, %v2535_v51 }
0x2a16   :  { %3463 = vtanh.f32 %v2545_v53  ;;  %v2638_v8 = vrot.slane %v2545_v53, 7 }
0x2a20   :  { %v3464_v54 = vpop.eup %3463 }
0x2a21   :  { %2548 = vrot.lane.b32.xlu0 %v3464_v54, %s3673_s18 }
0x2a93   :  { %v2549_v56 = vpop.permute.xlu0 %2548 }
0x2a94   :  { %v2551_v58 = vmul.f32 %v2549_v56, %v2530_v47 }
0x2a96   :  { %v2553_v59 = vrot.slane %v2551_v58, 5 }
0x2a98   :  { %2554 = vrot.lane.b32.xlu1 %v2553_v59, %s3674_s25 }
0x2b0a   :  { %v2555_v21 = vpop.permute.xlu1 %2554 }
0x2b0b   :  { %3111 = vmatmul.mubr.msk.f32.vlgmr.msra.gmra.mrb[22].mxu1 %vm1095_vm4, %v2555_v21 }
0x2bde   :  { %v2624_v60 = vpop.f32.mrb[22].mxu1 }
0x2bdf   :  { %v2629_v61 = vrot.slane %v2624_v60, 2  ;;  %v3112_v62 = vpop.f32.mrb[23].mxu1 }
0x2be1   :  { %v2631_v63 = vadd.f32 %v2629_v61, %v3942_v46  ;;  %v2657_v46 = vld [vmem:[%s4144_s10] sm:$0xff]  ;;  %s3625_s10 = scalar_lea.vmem %s2747_s1, 16 }
0x2be2   :  { %v3354_v14 = vpack.c.bf16 %v2658_v13, %v2657_v46  ;;  %p3626_p0 = scmp.ne.s32.totalorder %s2747_s1, %s3625_s10  ;;  %p3631_p2 = scmp.lt.s32.totalorder %s3629_s22, %s3625_s10 }
0x2be3   :  { %3465 = vtanh.f32 %v2631_v63  ;;  %v2632_v2 = vmul.f32 0.5, %v2631_v63 }
0x2be4   :  { %3355 = vmatpush3.bf16.msra.mxu0 %v3354_v14  ;;  %p3632_p3 = por %p3631_p2, %p3630_p1 }
0x2be5   :  { %3467 = vtanh.f32 %v2632_v2  ;;  %3117 = vmatprep.subr.mxu0 %v3668_v0  ;;  %v2660_v0 = vld [vmem:[%s4145_s11] sm:$0x1] }
0x2be6   :  { %p3633_p4 = pnand %p3632_p3, %p3626_p0 }
0x2be8   :  { %3118 = vmatpush3.msra.mxu0 %v2659_v15 }
0x2bed   :  { %v3466_v1 = vpop.eup %3465 }
0x2bee   :  { %2642 = vrot.lane.b32.xlu0 %v3466_v1, %s3671_s3 }
0x2bef   :  { %v3468_v3 = vpop.eup %3467 }
0x2bf0   :  { %v2634_v4 = vadd.f32 1.0, %v3468_v3 }
0x2bf2   :  { %v2635_v5 = vmul.f32 0.5, %v2634_v4 }
0x2bf4   :  { %v2640_v10 = vmul.f32 %v2638_v8, %v2635_v5 }
0x2c60   :  { %v2643_v6 = vpop.permute.xlu0 %2642 }
0x2c61   :  { %v2645_v7 = vmul.f32 %v2643_v6, %v2635_v5 }
0x2c63   :  { %2647 = vrot.lane.b32.xlu1 %v2645_v7, %s3672_s8 }
0x2cd5   :  { %v2648_v12 = vpop.permute.xlu1 %2647 }
0x2cd6   :  { %v2650_v11 = vadd.f32 %v2648_v12, %v2640_v10 }
0x2cd8   :  { %3469 = vtanh.f32 %v2650_v11 }
0x2ce2   :  { %v3470_v16 = vpop.eup %3469 }
0x2ce3   :  { %2653 = vrot.lane.b32.xlu0 %v3470_v16, %s3673_s18 }
0x2d55   :  { %v2654_v9 = vpop.permute.xlu0 %2653 }
0x2d56   :  { %v2656_v17 = vmul.f32 %v2654_v9, %v2635_v5 }
0x2d58   :  { %v2662_v18 = vrot.slane %v2656_v17, 6 }
0x2d5a   :  { %2663 = vrot.lane.b32.xlu1 %v2662_v18, %s3674_s25 }
0x2dcc   :  { %v2664_v19 = vpop.permute.xlu1 %2663 }
0x2dcd   :  { %3120 = vmatmul.mubr.msk.f32.vlgmr.msra.gmra.mrb[28].mxu0 %vm1095_vm4, %v2664_v19 }
0x2ea0   :  { %v2733_v20 = vpop.f32.mrb[28].mxu0 }
0x2ea1   :  { %v2734_v22 = vadd.f32 %v2733_v20, %v2660_v0  ;;  %v3121_v23 = vpop.f32.mrb[29].mxu0 }
0x2ea3   :  { %v2737_v24 = vmax.f32 %v2734_v22, 0.0 }
0x2ea5   :  { %2739 = vst.msk [vmem:[#allocation14] sm:$0x1] %vm2738_vm5, %v2737_v24 }
0x2ea6   :  { %3636 = shalt.err (!%p3633_p4)
}
0x2ea7   :  { %s3637_s11 = scalar_lea.hbm %s4146_s12, 16 }
0x2ea8   :  { %p3638_p5 = scmp.ne.s32.totalorder %s4146_s12, %s3637_s11  ;;  %p3641_p6 = scmp.lt.u32.totalorder %s3637_s11, %s4146_s12 }
0x2eaa   :  { %p3643_p7 = pnand %p3641_p6, %p3638_p5 }
0x2eac   :  { %3646 = shalt.err (!%p3643_p7)
}
0x2ead   :  { %2749 = dma.vmem_to_hbm [thread:$0]  %s2747_s1, 16, %s4146_s12, [#allocation4]  }
0x2eae   :  { %3655 = dma.done.wait [#allocation4], 16  }
0x2eaf   :  { %3656 = vsyncadd [#allocation4], 4294967280 }
0x2eb0   :  { %2753 = vsyncpa [#allocation3], 1 }
0x2eb1   :  { %2754 = vsyncpa [#allocation6], 1 }
0x2eb2   :  { %2755 = vsyncpa [#allocation9], 1 }
0x2eb3   :  { %2756 = vsyncpa [#allocation12], 1 }
0x2eb4   :  { %2757 = vsyncpa [#allocation4], 1 }

</bundles_post_ra>
